<compile_context>
chip_gen: v5e
topology: v5e:2x2
jax: 0.10.0
libtpu: 0.0.40
codegen_flags: <defaults>
</compile_context>

<pallas_src>
import functools

import jax
import jax.numpy as jnp
from jax.experimental import pallas as pl
from jax.experimental.pallas import tpu as pltpu  # noqa: F401  (kept for parity)


# ------------------------------ config ------------------------------------ #
class Cfg:
    d_model = 32
    n_heads = 2
    d_k = 16
    d_v = 16
    d_inner = 64
    inp_len = 8          # sequence length produced by the begin-enhance layer
    n_layers = 2
    n_similar_layers = 1
    n_vocab = 50
    dropout_rate = 0.0   # inference: dropout == identity
    temperature = 0.0    # 0 -> d_k ** 0.5 (as in MultiHeadAttention.__init__)


LN_EPS = 1e-6


# --------------------------- Pallas kernel --------------------------------- #
def _normalize(x):
    # PyTorch nn.LayerNorm semantics: biased variance, eps inside sqrt.
    mean = jnp.mean(x, axis=-1, keepdims=True)
    var = jnp.mean((x - mean) ** 2, axis=-1, keepdims=True)
    return (x - mean) * jax.lax.rsqrt(var + LN_EPS)


def _layer_norm(x, g, b):
    return _normalize(x) * g + b


def _fused_decoder_kernel(
    x0_ref,
    wq_ref, wk_ref, wv_ref, wo_ref,
    ln1_g_ref, ln1_b_ref,
    w1_ref, b1_ref, w2_ref, b2_ref,
    ln2_g_ref, ln2_b_ref,
    vocab_w_ref, vocab_b_ref,
    o_ref,
    *, B, L, D, n_heads, d_k, d_v, n_layers,
):
    f32 = jnp.float32
    M = B * L

    x = x0_ref[...]                                            # (M, D)

    for layer in range(n_layers):                 # static unroll (n_layers tiny)
        # --- multi-head self-attention, fully batched over heads ----------- #
        # Broadcast x over the head dim once; per-head projections then issue
        # as batched dot_generals (no lane slicing anywhere).
        xb = jnp.broadcast_to(x[None, :, :], (n_heads, M, D))   # (H, M, D)
        # 1/temperature is already folded into wq columns at prep time.
        q = jnp.einsum('hmd,hde->hme', xb, wq_ref[layer],
                       preferred_element_type=f32)              # (H, M, dk)
        k = jnp.einsum('hmd,hde->hme', xb, wk_ref[layer],
                       preferred_element_type=f32)              # (H, M, dk)
        v = jnp.einsum('hmd,hde->hme', xb, wv_ref[layer],
                       preferred_element_type=f32)              # (H, M, dv)

        # (H, B*L, d) -> (H*B, L, d): tile-aligned sublane regrouping (cheap).
        q = q.reshape(n_heads * B, L, d_k)
        k = k.reshape(n_heads * B, L, d_k)
        v = v.reshape(n_heads * B, L, d_v)

        # Scores contract the LAST dim of both operands -> no explicit K^T.
        s = jnp.einsum('nqd,nkd->nqk', q, k,
                       preferred_element_type=f32)              # (H*B, L, L)
        s = s - jnp.max(s, axis=-1, keepdims=True)
        p = jnp.exp(s)
        p = p / jnp.sum(p, axis=-1, keepdims=True)              # exact softmax
        o = jnp.einsum('nqk,nkd->nqd', p, v,
                       preferred_element_type=f32)              # (H*B, L, dv)

        # Output projection: concat-heads @ wo == sum_h (o_h @ wo_h).
        o = o.reshape(n_heads, M, d_v)                          # (H, M, dv)
        yh = jnp.einsum('hmd,hdo->hmo', o, wo_ref[layer],
                        preferred_element_type=f32)             # (H, M, D)
        y = jnp.sum(yh, axis=0) + x                             # residual
        # LN affine kept in-kernel: the affine'd value feeds the residual path
        # below, so it cannot be folded into the FFN weights.
        y = _layer_norm(y, ln1_g_ref[layer], ln1_b_ref[layer])

        # --- position-wise feed-forward + residual + LayerNorm ------------- #
        h1 = jnp.maximum(
            jnp.dot(y, w1_ref[layer], preferred_element_type=f32)
            + b1_ref[layer], 0.0)
        h2 = (jnp.dot(h1, w2_ref[layer], preferred_element_type=f32)
              + b2_ref[layer])
        z = h2 + y
        if layer == n_layers - 1:
            # Final LN affine is folded into the vocab projection at prep time.
            x = _normalize(z)
        else:
            x = _layer_norm(z, ln2_g_ref[layer], ln2_b_ref[layer])

    # vocab projection (lane-dense, n_vocab padded to 128) + folded LN bias
    o_ref[...] = (jnp.dot(x, vocab_w_ref[...], preferred_element_type=f32)
                  + vocab_b_ref[...]).astype(o_ref.dtype)


# ------------------------ one-time parameter packing ----------------------- #
def prepare_params(params, cfg: Cfg):
    """Host-side, one-time weight packing (do NOT call per forward)."""
    D, H, dk, dv = cfg.d_model, cfg.n_heads, cfg.d_k, cfg.d_v
    temp = cfg.temperature if cfg.temperature >= 1e-8 else cfg.d_k ** 0.5
    layers = params["layers"]

    def per_head(w, d):                       # (D, H*d) -> (H, D, d)
        return w.reshape(D, H, d).transpose(1, 0, 2)

    wq3 = jnp.stack([per_head(lp["wq"] / temp, dk) for lp in layers])
    wk3 = jnp.stack([per_head(lp["wk"], dk) for lp in layers])
    wv3 = jnp.stack([per_head(lp["wv"], dv) for lp in layers])
    wo3 = jnp.stack([lp["wo"].reshape(H, dv, D) for lp in layers])

    ln1_g = jnp.stack([lp["ln1_g"] for lp in layers])
    ln1_b = jnp.stack([lp["ln1_b"] for lp in layers])
    w1 = jnp.stack([lp["w1"] for lp in layers])
    b1 = jnp.stack([lp["b1"] for lp in layers])
    w2 = jnp.stack([lp["w2"] for lp in layers])
    b2 = jnp.stack([lp["b2"] for lp in layers])
    ln2_g = jnp.stack([lp["ln2_g"] for lp in layers])
    ln2_b = jnp.stack([lp["ln2_b"] for lp in layers])

    # Fold the final layer's LayerNorm affine into the vocab projection:
    # (z_hat*g + b) @ W == z_hat @ (W * g^T) + b @ W
    g_last = layers[-1]["ln2_g"]                       # (1, D)
    b_last = layers[-1]["ln2_b"]                       # (1, D)
    vocab_w_f = params["vocab_w"] * g_last.T           # (D, n_vocab)
    vocab_b_f = b_last @ params["vocab_w"]             # (1, n_vocab)

    # Pad vocab projection to a 128-lane-dense output; sliced back in wrapper.
    v_pad = max(128, pl.cdiv(cfg.n_vocab, 128) * 128)
    vocab_w_p = jnp.zeros((D, v_pad), jnp.float32).at[:, :cfg.n_vocab].set(vocab_w_f)
    vocab_b_p = jnp.zeros((1, v_pad), jnp.float32).at[:, :cfg.n_vocab].set(vocab_b_f)

    return {
        "enh_w": params["enh_w"], "enh_b": params["enh_b"],
        "wq": wq3, "wk": wk3, "wv": wv3, "wo": wo3,
        "ln1_g": ln1_g, "ln1_b": ln1_b,
        "w1": w1, "b1": b1, "w2": w2, "b2": b2,
        "ln2_g": ln2_g, "ln2_b": ln2_b,
        "vocab_w": vocab_w_p, "vocab_b": vocab_b_p,
    }


# --------------------------------- wrapper ---------------------------------- #
def decoder_pyramid_forward(inp, prepped, cfg: Cfg):
    """inp: (B, d_model) -> logits (B, inp_len, n_vocab)."""
    B = inp.shape[0]
    D, L = cfg.d_model, cfg.inp_len
    NL = cfg.n_layers * cfg.n_similar_layers
    M = B * L
    v_pad = prepped["vocab_w"].shape[1]

    # Enhance-begin linear in plain XLA; the (B, L*D) -> (B*L, D) reshape is a
    # free metadata reshape in HBM (no in-kernel row-copy loop).
    x0 = (inp @ prepped["enh_w"] + prepped["enh_b"]).reshape(M, D)

    kernel = functools.partial(
        _fused_decoder_kernel,
        B=B, L=L, D=D, n_heads=cfg.n_heads, d_k=cfg.d_k, d_v=cfg.d_v,
        n_layers=NL)

    # Single grid-less invocation: everything fits trivially in VMEM.
    # (A batch grid split across v7x's two TensorCores is deliberately skipped
    #  at B=2; it only pays off for much larger batches.)
    out = pl.pallas_call(
        kernel,
        out_shape=jax.ShapeDtypeStruct((M, v_pad), jnp.float32),
    )(x0,
      prepped["wq"], prepped["wk"], prepped["wv"], prepped["wo"],
      prepped["ln1_g"], prepped["ln1_b"],
      prepped["w1"], prepped["b1"], prepped["w2"], prepped["b2"],
      prepped["ln2_g"], prepped["ln2_b"],
      prepped["vocab_w"], prepped["vocab_b"])

    return out[:, :cfg.n_vocab].reshape(B, L, cfg.n_vocab)


# --------------------------- pure-JAX reference ----------------------------- #
def ref_encoder_layer(x, p, cfg: Cfg):
    B, L, D = x.shape
    H, dk, dv = cfg.n_heads, cfg.d_k, cfg.d_v
    temp = cfg.temperature if cfg.temperature >= 1e-8 else cfg.d_k ** 0.5

    q = (x @ p["wq"]).reshape(B, L, H, dk).transpose(0, 2, 1, 3)
    k = (x @ p["wk"]).reshape(B, L, H, dk).transpose(0, 2, 1, 3)
    v = (x @ p["wv"]).reshape(B, L, H, dv).transpose(0, 2, 1, 3)
    attn = jnp.einsum("bhqd,bhkd->bhqk", q / temp, k)
    attn = jax.nn.softmax(attn, axis=-1)
    o = jnp.einsum("bhqk,bhkd->bhqd", attn, v).transpose(0, 2, 1, 3).reshape(B, L, H * dv)
    y = o @ p["wo"] + x
    mean = jnp.mean(y, axis=-1, keepdims=True)
    var = jnp.mean((y - mean) ** 2, axis=-1, keepdims=True)
    y = (y - mean) / jnp.sqrt(var + LN_EPS) * p["ln1_g"] + p["ln1_b"]

    h1 = jax.nn.relu(y @ p["w1"] + p["b1"])
    h2 = h1 @ p["w2"] + p["b2"]
    z = h2 + y
    mean = jnp.mean(z, axis=-1, keepdims=True)
    var = jnp.mean((z - mean) ** 2, axis=-1, keepdims=True)
    return (z - mean) / jnp.sqrt(var + LN_EPS) * p["ln2_g"] + p["ln2_b"]


def ref_forward(inp, params, cfg: Cfg):
    B = inp.shape[0]
    out = (inp @ params["enh_w"] + params["enh_b"]).reshape(B, cfg.inp_len, cfg.d_model)
    for lp in params["layers"]:
        out = ref_encoder_layer(out, lp, cfg)
    return (out.reshape(B * cfg.inp_len, cfg.d_model) @ params["vocab_w"]).reshape(
        B, cfg.inp_len, cfg.n_vocab
    )


# ------------------------------ param init --------------------------------- #
def init_params(key, cfg: Cfg):
    D, H, dk, dv, di = cfg.d_model, cfg.n_heads, cfg.d_k, cfg.d_v, cfg.d_inner
    NL = cfg.n_layers * cfg.n_similar_layers
    scale = 0.05

    def nrm(k, shape, s=scale):
        return (s * jax.random.normal(k, shape)).astype(jnp.float32)

    keys = jax.random.split(key, 3 + 12 * NL)
    ki = iter(keys)

    params = {
        "enh_w": nrm(next(ki), (D, D * cfg.inp_len)),
        "enh_b": nrm(next(ki), (1, D * cfg.inp_len)),
        "vocab_w": nrm(next(ki), (D, cfg.n_vocab)),
        "layers": [],
    }
    for _ in range(NL):
        # LayerNorm affines are initialized to non-trivial values so that the
        # LN handling (incl. the final-LN fold into vocab_w) is actually tested.
        params["layers"].append({
            "wq": nrm(next(ki), (D, H * dk)),
            "wk": nrm(next(ki), (D, H * dk)),
            "wv": nrm(next(ki), (D, H * dv)),
            "wo": nrm(next(ki), (H * dv, D)),
            "ln1_g": 1.0 + nrm(next(ki), (1, D), 0.1),
            "ln1_b": nrm(next(ki), (1, D), 0.1),
            "w1": nrm(next(ki), (D, di)),
            "b1": nrm(next(ki), (1, di)),
            "w2": nrm(next(ki), (di, D)),
            "b2": nrm(next(ki), (1, D)),
            "ln2_g": 1.0 + nrm(next(ki), (1, D), 0.1),
            "ln2_b": nrm(next(ki), (1, D), 0.1),
        })
    return params


# --------------------------------- main ------------------------------------ #
if __name__ == "__main__":
    cfg = Cfg()
    key = jax.random.PRNGKey(0)
    k_inp, k_par = jax.random.split(key)

    batch = 2
    inp = jax.random.normal(k_inp, (batch, cfg.d_model), dtype=jnp.float32)
    params = init_params(k_par, cfg)

    prepped = prepare_params(params, cfg)            # one-time packing
    fwd = jax.jit(lambda x, p: decoder_pyramid_forward(x, p, cfg))

    out = jax.block_until_ready(fwd(inp, prepped))

    ref = ref_forward(inp, params, cfg)
    assert out.shape == (batch, cfg.inp_len, cfg.n_vocab), out.shape
    assert jnp.allclose(out, ref, atol=1e-4, rtol=1e-3), (
        float(jnp.max(jnp.abs(out - ref)))
    )

    print("KERNEL_OK")
</pallas_src>

<mosaic_0001>
module attributes {stable_mosaic.version = 11 : i64} {
  func.func @_fused_decoder_kernel(%arg0: memref<16x32xf32, #tpu.memory_space<vmem>>, %arg1: memref<2x2x32x16xf32, #tpu.memory_space<vmem>>, %arg2: memref<2x2x32x16xf32, #tpu.memory_space<vmem>>, %arg3: memref<2x2x32x16xf32, #tpu.memory_space<vmem>>, %arg4: memref<2x2x16x32xf32, #tpu.memory_space<vmem>>, %arg5: memref<2x1x32xf32, #tpu.memory_space<vmem>>, %arg6: memref<2x1x32xf32, #tpu.memory_space<vmem>>, %arg7: memref<2x32x64xf32, #tpu.memory_space<vmem>>, %arg8: memref<2x1x64xf32, #tpu.memory_space<vmem>>, %arg9: memref<2x64x32xf32, #tpu.memory_space<vmem>>, %arg10: memref<2x1x32xf32, #tpu.memory_space<vmem>>, %arg11: memref<2x1x32xf32, #tpu.memory_space<vmem>>, %arg12: memref<2x1x32xf32, #tpu.memory_space<vmem>>, %arg13: memref<32x128xf32, #tpu.memory_space<vmem>>, %arg14: memref<1x128xf32, #tpu.memory_space<vmem>>, %arg15: memref<16x128xf32, #tpu.memory_space<vmem>>) attributes {dimension_semantics = [], scalar_prefetch = 0 : i64, scratch_operands = 0 : i64, tpu.core_type = #tpu.core_type<tc>} {
    %c0 = arith.constant 0 : index
    %c0_0 = arith.constant 0 : index
    %0 = vector.load %arg0[%c0, %c0_0] : memref<16x32xf32, #tpu.memory_space<vmem>>, vector<16x32xf32>
    %1 = vector.shape_cast %0 : vector<16x32xf32> to vector<1x16x32xf32>
    %2 = vector.shape_cast %1 : vector<1x16x32xf32> to vector<1x16x32xf32>
    %3 = vector.broadcast %2 : vector<1x16x32xf32> to vector<2x16x32xf32>
    %c0_1 = arith.constant 0 : index
    %c0_2 = arith.constant 0 : index
    %c0_3 = arith.constant 0 : index
    %c0_4 = arith.constant 0 : index
    %4 = vector.load %arg1[%c0_1, %c0_2, %c0_3, %c0_4] : memref<2x2x32x16xf32, #tpu.memory_space<vmem>>, vector<1x2x32x16xf32>
    %5 = vector.shape_cast %4 : vector<1x2x32x16xf32> to vector<2x32x16xf32>
    "tpu.trace_start"() <{level = 10 : i32, message = "hmd,hde->hme"}> : () -> ()
    %cst = arith.constant dense<0.000000e+00> : vector<2x16x16xf32>
    %6 = tpu.matmul %3, %5, %cst {dimension_numbers = #tpu.dot_dimension_numbers<[2], [1], [1], [2], [0, 0, 0, 1, 1, 2], [0], [0]>} : vector<2x16x32xf32>, vector<2x32x16xf32>, vector<2x16x16xf32> -> vector<2x16x16xf32>
    "tpu.trace_stop"() : () -> ()
    %c0_5 = arith.constant 0 : index
    %c0_6 = arith.constant 0 : index
    %c0_7 = arith.constant 0 : index
    %c0_8 = arith.constant 0 : index
    %7 = vector.load %arg2[%c0_5, %c0_6, %c0_7, %c0_8] : memref<2x2x32x16xf32, #tpu.memory_space<vmem>>, vector<1x2x32x16xf32>
    %8 = vector.shape_cast %7 : vector<1x2x32x16xf32> to vector<2x32x16xf32>
    "tpu.trace_start"() <{level = 10 : i32, message = "hmd,hde->hme"}> : () -> ()
    %cst_9 = arith.constant dense<0.000000e+00> : vector<2x16x16xf32>
    %9 = tpu.matmul %3, %8, %cst_9 {dimension_numbers = #tpu.dot_dimension_numbers<[2], [1], [1], [2], [0, 0, 0, 1, 1, 2], [0], [0]>} : vector<2x16x32xf32>, vector<2x32x16xf32>, vector<2x16x16xf32> -> vector<2x16x16xf32>
    "tpu.trace_stop"() : () -> ()
    %c0_10 = arith.constant 0 : index
    %c0_11 = arith.constant 0 : index
    %c0_12 = arith.constant 0 : index
    %c0_13 = arith.constant 0 : index
    %10 = vector.load %arg3[%c0_10, %c0_11, %c0_12, %c0_13] : memref<2x2x32x16xf32, #tpu.memory_space<vmem>>, vector<1x2x32x16xf32>
    %11 = vector.shape_cast %10 : vector<1x2x32x16xf32> to vector<2x32x16xf32>
    "tpu.trace_start"() <{level = 10 : i32, message = "hmd,hde->hme"}> : () -> ()
    %cst_14 = arith.constant dense<0.000000e+00> : vector<2x16x16xf32>
    %12 = tpu.matmul %3, %11, %cst_14 {dimension_numbers = #tpu.dot_dimension_numbers<[2], [1], [1], [2], [0, 0, 0, 1, 1, 2], [0], [0]>} : vector<2x16x32xf32>, vector<2x32x16xf32>, vector<2x16x16xf32> -> vector<2x16x16xf32>
    "tpu.trace_stop"() : () -> ()
    %13 = vector.shape_cast %6 : vector<2x16x16xf32> to vector<4x8x16xf32>
    %14 = vector.shape_cast %9 : vector<2x16x16xf32> to vector<4x8x16xf32>
    %15 = vector.shape_cast %12 : vector<2x16x16xf32> to vector<4x8x16xf32>
    "tpu.trace_start"() <{level = 10 : i32, message = "nqd,nkd->nqk"}> : () -> ()
    %cst_15 = arith.constant dense<0.000000e+00> : vector<4x8x8xf32>
    %16 = tpu.matmul %13, %14, %cst_15 {dimension_numbers = #tpu.dot_dimension_numbers<[2], [2], [1], [1], [0, 0, 0, 1, 1, 1], [0], [0]>} : vector<4x8x16xf32>, vector<4x8x16xf32>, vector<4x8x8xf32> -> vector<4x8x8xf32>
    "tpu.trace_stop"() : () -> ()
    %cst_16 = arith.constant dense<0xFF800000> : vector<4x8xf32>
    %17 = vector.multi_reduction <maximumf>, %16, %cst_16 [2] : vector<4x8x8xf32> to vector<4x8xf32>
    %18 = vector.shape_cast %17 : vector<4x8xf32> to vector<4x8x1xf32>
    %19 = vector.broadcast %18 : vector<4x8x1xf32> to vector<4x8x8xf32>
    %20 = arith.subf %16, %19 : vector<4x8x8xf32>
    %21 = math.exp %20 : vector<4x8x8xf32>
    %cst_17 = arith.constant dense<0.000000e+00> : vector<4x8xf32>
    %22 = vector.multi_reduction <add>, %21, %cst_17 [2] : vector<4x8x8xf32> to vector<4x8xf32>
    %23 = vector.shape_cast %22 : vector<4x8xf32> to vector<4x8x1xf32>
    %24 = vector.broadcast %23 : vector<4x8x1xf32> to vector<4x8x8xf32>
    %25 = arith.divf %21, %24 : vector<4x8x8xf32>
    "tpu.trace_start"() <{level = 10 : i32, message = "nqk,nkd->nqd"}> : () -> ()
    %cst_18 = arith.constant dense<0.000000e+00> : vector<4x8x16xf32>
    %26 = tpu.matmul %25, %15, %cst_18 {dimension_numbers = #tpu.dot_dimension_numbers<[2], [1], [1], [2], [0, 0, 0, 1, 1, 2], [0], [0]>} : vector<4x8x8xf32>, vector<4x8x16xf32>, vector<4x8x16xf32> -> vector<4x8x16xf32>
    "tpu.trace_stop"() : () -> ()
    %27 = vector.shape_cast %26 : vector<4x8x16xf32> to vector<2x16x16xf32>
    %c0_19 = arith.constant 0 : index
    %c0_20 = arith.constant 0 : index
    %c0_21 = arith.constant 0 : index
    %c0_22 = arith.constant 0 : index
    %28 = vector.load %arg4[%c0_19, %c0_20, %c0_21, %c0_22] : memref<2x2x16x32xf32, #tpu.memory_space<vmem>>, vector<1x2x16x32xf32>
    %29 = vector.shape_cast %28 : vector<1x2x16x32xf32> to vector<2x16x32xf32>
    "tpu.trace_start"() <{level = 10 : i32, message = "hmd,hdo->hmo"}> : () -> ()
    %cst_23 = arith.constant dense<0.000000e+00> : vector<2x16x32xf32>
    %30 = tpu.matmul %27, %29, %cst_23 {dimension_numbers = #tpu.dot_dimension_numbers<[2], [1], [1], [2], [0, 0, 0, 1, 1, 2], [0], [0]>} : vector<2x16x16xf32>, vector<2x16x32xf32>, vector<2x16x32xf32> -> vector<2x16x32xf32>
    "tpu.trace_stop"() : () -> ()
    %cst_24 = arith.constant dense<0.000000e+00> : vector<16x32xf32>
    %31 = vector.multi_reduction <add>, %30, %cst_24 [0] : vector<2x16x32xf32> to vector<16x32xf32>
    %32 = arith.addf %31, %0 : vector<16x32xf32>
    %c0_25 = arith.constant 0 : index
    %c0_26 = arith.constant 0 : index
    %c0_27 = arith.constant 0 : index
    %33 = vector.load %arg5[%c0_25, %c0_26, %c0_27] : memref<2x1x32xf32, #tpu.memory_space<vmem>>, vector<1x1x32xf32>
    %34 = vector.shape_cast %33 : vector<1x1x32xf32> to vector<1x32xf32>
    %c0_28 = arith.constant 0 : index
    %c0_29 = arith.constant 0 : index
    %c0_30 = arith.constant 0 : index
    %35 = vector.load %arg6[%c0_28, %c0_29, %c0_30] : memref<2x1x32xf32, #tpu.memory_space<vmem>>, vector<1x1x32xf32>
    %36 = vector.shape_cast %35 : vector<1x1x32xf32> to vector<1x32xf32>
    %cst_31 = arith.constant dense<0.000000e+00> : vector<16xf32>
    %37 = vector.multi_reduction <add>, %32, %cst_31 [1] : vector<16x32xf32> to vector<16xf32>
    %38 = vector.shape_cast %37 : vector<16xf32> to vector<16x1xf32>
    %cst_32 = arith.constant 3.200000e+01 : f32
    %39 = vector.broadcast %cst_32 : f32 to vector<16x1xf32>
    %40 = arith.divf %38, %39 : vector<16x1xf32>
    %41 = vector.broadcast %40 : vector<16x1xf32> to vector<16x32xf32>
    %42 = arith.subf %32, %41 : vector<16x32xf32>
    %43 = arith.mulf %42, %42 : vector<16x32xf32>
    %cst_33 = arith.constant dense<0.000000e+00> : vector<16xf32>
    %44 = vector.multi_reduction <add>, %43, %cst_33 [1] : vector<16x32xf32> to vector<16xf32>
    %45 = vector.shape_cast %44 : vector<16xf32> to vector<16x1xf32>
    %cst_34 = arith.constant 3.200000e+01 : f32
    %46 = vector.broadcast %cst_34 : f32 to vector<16x1xf32>
    %47 = arith.divf %45, %46 : vector<16x1xf32>
    %48 = vector.broadcast %40 : vector<16x1xf32> to vector<16x32xf32>
    %49 = arith.subf %32, %48 : vector<16x32xf32>
    %cst_35 = arith.constant 9.99999997E-7 : f32
    %50 = vector.broadcast %cst_35 : f32 to vector<16x1xf32>
    %51 = arith.addf %47, %50 : vector<16x1xf32>
    %52 = math.rsqrt %51 : vector<16x1xf32>
    %53 = vector.broadcast %52 : vector<16x1xf32> to vector<16x32xf32>
    %54 = arith.mulf %49, %53 : vector<16x32xf32>
    %55 = vector.broadcast %34 : vector<1x32xf32> to vector<16x32xf32>
    %56 = arith.mulf %54, %55 : vector<16x32xf32>
    %57 = vector.broadcast %36 : vector<1x32xf32> to vector<16x32xf32>
    %58 = arith.addf %56, %57 : vector<16x32xf32>
    %c0_36 = arith.constant 0 : index
    %c0_37 = arith.constant 0 : index
    %c0_38 = arith.constant 0 : index
    %59 = vector.load %arg7[%c0_36, %c0_37, %c0_38] : memref<2x32x64xf32, #tpu.memory_space<vmem>>, vector<1x32x64xf32>
    %60 = vector.shape_cast %59 : vector<1x32x64xf32> to vector<32x64xf32>
    %cst_39 = arith.constant dense<0.000000e+00> : vector<16x64xf32>
    %61 = tpu.matmul %58, %60, %cst_39 {dimension_numbers = #tpu.dot_dimension_numbers<[1], [0], [0], [1], [0, 0, 1, 1], [], []>} : vector<16x32xf32>, vector<32x64xf32>, vector<16x64xf32> -> vector<16x64xf32>
    %c0_40 = arith.constant 0 : index
    %c0_41 = arith.constant 0 : index
    %c0_42 = arith.constant 0 : index
    %62 = vector.load %arg8[%c0_40, %c0_41, %c0_42] : memref<2x1x64xf32, #tpu.memory_space<vmem>>, vector<1x1x64xf32>
    %63 = vector.shape_cast %62 : vector<1x1x64xf32> to vector<1x64xf32>
    %64 = vector.broadcast %63 : vector<1x64xf32> to vector<16x64xf32>
    %65 = arith.addf %61, %64 : vector<16x64xf32>
    %cst_43 = arith.constant 0.000000e+00 : f32
    %66 = vector.broadcast %cst_43 : f32 to vector<16x64xf32>
    %67 = arith.maximumf %65, %66 : vector<16x64xf32>
    %c0_44 = arith.constant 0 : index
    %c0_45 = arith.constant 0 : index
    %c0_46 = arith.constant 0 : index
    %68 = vector.load %arg9[%c0_44, %c0_45, %c0_46] : memref<2x64x32xf32, #tpu.memory_space<vmem>>, vector<1x64x32xf32>
    %69 = vector.shape_cast %68 : vector<1x64x32xf32> to vector<64x32xf32>
    %cst_47 = arith.constant dense<0.000000e+00> : vector<16x32xf32>
    %70 = tpu.matmul %67, %69, %cst_47 {dimension_numbers = #tpu.dot_dimension_numbers<[1], [0], [0], [1], [0, 0, 1, 1], [], []>} : vector<16x64xf32>, vector<64x32xf32>, vector<16x32xf32> -> vector<16x32xf32>
    %c0_48 = arith.constant 0 : index
    %c0_49 = arith.constant 0 : index
    %c0_50 = arith.constant 0 : index
    %71 = vector.load %arg10[%c0_48, %c0_49, %c0_50] : memref<2x1x32xf32, #tpu.memory_space<vmem>>, vector<1x1x32xf32>
    %72 = vector.shape_cast %71 : vector<1x1x32xf32> to vector<1x32xf32>
    %73 = vector.broadcast %72 : vector<1x32xf32> to vector<16x32xf32>
    %74 = arith.addf %70, %73 : vector<16x32xf32>
    %75 = arith.addf %74, %58 : vector<16x32xf32>
    %c0_51 = arith.constant 0 : index
    %c0_52 = arith.constant 0 : index
    %c0_53 = arith.constant 0 : index
    %76 = vector.load %arg11[%c0_51, %c0_52, %c0_53] : memref<2x1x32xf32, #tpu.memory_space<vmem>>, vector<1x1x32xf32>
    %77 = vector.shape_cast %76 : vector<1x1x32xf32> to vector<1x32xf32>
    %c0_54 = arith.constant 0 : index
    %c0_55 = arith.constant 0 : index
    %c0_56 = arith.constant 0 : index
    %78 = vector.load %arg12[%c0_54, %c0_55, %c0_56] : memref<2x1x32xf32, #tpu.memory_space<vmem>>, vector<1x1x32xf32>
    %79 = vector.shape_cast %78 : vector<1x1x32xf32> to vector<1x32xf32>
    %cst_57 = arith.constant dense<0.000000e+00> : vector<16xf32>
    %80 = vector.multi_reduction <add>, %75, %cst_57 [1] : vector<16x32xf32> to vector<16xf32>
    %81 = vector.shape_cast %80 : vector<16xf32> to vector<16x1xf32>
    %cst_58 = arith.constant 3.200000e+01 : f32
    %82 = vector.broadcast %cst_58 : f32 to vector<16x1xf32>
    %83 = arith.divf %81, %82 : vector<16x1xf32>
    %84 = vector.broadcast %83 : vector<16x1xf32> to vector<16x32xf32>
    %85 = arith.subf %75, %84 : vector<16x32xf32>
    %86 = arith.mulf %85, %85 : vector<16x32xf32>
    %cst_59 = arith.constant dense<0.000000e+00> : vector<16xf32>
    %87 = vector.multi_reduction <add>, %86, %cst_59 [1] : vector<16x32xf32> to vector<16xf32>
    %88 = vector.shape_cast %87 : vector<16xf32> to vector<16x1xf32>
    %cst_60 = arith.constant 3.200000e+01 : f32
    %89 = vector.broadcast %cst_60 : f32 to vector<16x1xf32>
    %90 = arith.divf %88, %89 : vector<16x1xf32>
    %91 = vector.broadcast %83 : vector<16x1xf32> to vector<16x32xf32>
    %92 = arith.subf %75, %91 : vector<16x32xf32>
    %cst_61 = arith.constant 9.99999997E-7 : f32
    %93 = vector.broadcast %cst_61 : f32 to vector<16x1xf32>
    %94 = arith.addf %90, %93 : vector<16x1xf32>
    %95 = math.rsqrt %94 : vector<16x1xf32>
    %96 = vector.broadcast %95 : vector<16x1xf32> to vector<16x32xf32>
    %97 = arith.mulf %92, %96 : vector<16x32xf32>
    %98 = vector.broadcast %77 : vector<1x32xf32> to vector<16x32xf32>
    %99 = arith.mulf %97, %98 : vector<16x32xf32>
    %100 = vector.broadcast %79 : vector<1x32xf32> to vector<16x32xf32>
    %101 = arith.addf %99, %100 : vector<16x32xf32>
    %102 = vector.shape_cast %101 : vector<16x32xf32> to vector<1x16x32xf32>
    %103 = vector.shape_cast %102 : vector<1x16x32xf32> to vector<1x16x32xf32>
    %104 = vector.broadcast %103 : vector<1x16x32xf32> to vector<2x16x32xf32>
    %c1 = arith.constant 1 : index
    %c0_62 = arith.constant 0 : index
    %c0_63 = arith.constant 0 : index
    %c0_64 = arith.constant 0 : index
    %105 = vector.load %arg1[%c1, %c0_62, %c0_63, %c0_64] : memref<2x2x32x16xf32, #tpu.memory_space<vmem>>, vector<1x2x32x16xf32>
    %106 = vector.shape_cast %105 : vector<1x2x32x16xf32> to vector<2x32x16xf32>
    "tpu.trace_start"() <{level = 10 : i32, message = "hmd,hde->hme"}> : () -> ()
    %cst_65 = arith.constant dense<0.000000e+00> : vector<2x16x16xf32>
    %107 = tpu.matmul %104, %106, %cst_65 {dimension_numbers = #tpu.dot_dimension_numbers<[2], [1], [1], [2], [0, 0, 0, 1, 1, 2], [0], [0]>} : vector<2x16x32xf32>, vector<2x32x16xf32>, vector<2x16x16xf32> -> vector<2x16x16xf32>
    "tpu.trace_stop"() : () -> ()
    %c1_66 = arith.constant 1 : index
    %c0_67 = arith.constant 0 : index
    %c0_68 = arith.constant 0 : index
    %c0_69 = arith.constant 0 : index
    %108 = vector.load %arg2[%c1_66, %c0_67, %c0_68, %c0_69] : memref<2x2x32x16xf32, #tpu.memory_space<vmem>>, vector<1x2x32x16xf32>
    %109 = vector.shape_cast %108 : vector<1x2x32x16xf32> to vector<2x32x16xf32>
    "tpu.trace_start"() <{level = 10 : i32, message = "hmd,hde->hme"}> : () -> ()
    %cst_70 = arith.constant dense<0.000000e+00> : vector<2x16x16xf32>
    %110 = tpu.matmul %104, %109, %cst_70 {dimension_numbers = #tpu.dot_dimension_numbers<[2], [1], [1], [2], [0, 0, 0, 1, 1, 2], [0], [0]>} : vector<2x16x32xf32>, vector<2x32x16xf32>, vector<2x16x16xf32> -> vector<2x16x16xf32>
    "tpu.trace_stop"() : () -> ()
    %c1_71 = arith.constant 1 : index
    %c0_72 = arith.constant 0 : index
    %c0_73 = arith.constant 0 : index
    %c0_74 = arith.constant 0 : index
    %111 = vector.load %arg3[%c1_71, %c0_72, %c0_73, %c0_74] : memref<2x2x32x16xf32, #tpu.memory_space<vmem>>, vector<1x2x32x16xf32>
    %112 = vector.shape_cast %111 : vector<1x2x32x16xf32> to vector<2x32x16xf32>
    "tpu.trace_start"() <{level = 10 : i32, message = "hmd,hde->hme"}> : () -> ()
    %cst_75 = arith.constant dense<0.000000e+00> : vector<2x16x16xf32>
    %113 = tpu.matmul %104, %112, %cst_75 {dimension_numbers = #tpu.dot_dimension_numbers<[2], [1], [1], [2], [0, 0, 0, 1, 1, 2], [0], [0]>} : vector<2x16x32xf32>, vector<2x32x16xf32>, vector<2x16x16xf32> -> vector<2x16x16xf32>
    "tpu.trace_stop"() : () -> ()
    %114 = vector.shape_cast %107 : vector<2x16x16xf32> to vector<4x8x16xf32>
    %115 = vector.shape_cast %110 : vector<2x16x16xf32> to vector<4x8x16xf32>
    %116 = vector.shape_cast %113 : vector<2x16x16xf32> to vector<4x8x16xf32>
    "tpu.trace_start"() <{level = 10 : i32, message = "nqd,nkd->nqk"}> : () -> ()
    %cst_76 = arith.constant dense<0.000000e+00> : vector<4x8x8xf32>
    %117 = tpu.matmul %114, %115, %cst_76 {dimension_numbers = #tpu.dot_dimension_numbers<[2], [2], [1], [1], [0, 0, 0, 1, 1, 1], [0], [0]>} : vector<4x8x16xf32>, vector<4x8x16xf32>, vector<4x8x8xf32> -> vector<4x8x8xf32>
    "tpu.trace_stop"() : () -> ()
    %cst_77 = arith.constant dense<0xFF800000> : vector<4x8xf32>
    %118 = vector.multi_reduction <maximumf>, %117, %cst_77 [2] : vector<4x8x8xf32> to vector<4x8xf32>
    %119 = vector.shape_cast %118 : vector<4x8xf32> to vector<4x8x1xf32>
    %120 = vector.broadcast %119 : vector<4x8x1xf32> to vector<4x8x8xf32>
    %121 = arith.subf %117, %120 : vector<4x8x8xf32>
    %122 = math.exp %121 : vector<4x8x8xf32>
    %cst_78 = arith.constant dense<0.000000e+00> : vector<4x8xf32>
    %123 = vector.multi_reduction <add>, %122, %cst_78 [2] : vector<4x8x8xf32> to vector<4x8xf32>
    %124 = vector.shape_cast %123 : vector<4x8xf32> to vector<4x8x1xf32>
    %125 = vector.broadcast %124 : vector<4x8x1xf32> to vector<4x8x8xf32>
    %126 = arith.divf %122, %125 : vector<4x8x8xf32>
    "tpu.trace_start"() <{level = 10 : i32, message = "nqk,nkd->nqd"}> : () -> ()
    %cst_79 = arith.constant dense<0.000000e+00> : vector<4x8x16xf32>
    %127 = tpu.matmul %126, %116, %cst_79 {dimension_numbers = #tpu.dot_dimension_numbers<[2], [1], [1], [2], [0, 0, 0, 1, 1, 2], [0], [0]>} : vector<4x8x8xf32>, vector<4x8x16xf32>, vector<4x8x16xf32> -> vector<4x8x16xf32>
    "tpu.trace_stop"() : () -> ()
    %128 = vector.shape_cast %127 : vector<4x8x16xf32> to vector<2x16x16xf32>
    %c1_80 = arith.constant 1 : index
    %c0_81 = arith.constant 0 : index
    %c0_82 = arith.constant 0 : index
    %c0_83 = arith.constant 0 : index
    %129 = vector.load %arg4[%c1_80, %c0_81, %c0_82, %c0_83] : memref<2x2x16x32xf32, #tpu.memory_space<vmem>>, vector<1x2x16x32xf32>
    %130 = vector.shape_cast %129 : vector<1x2x16x32xf32> to vector<2x16x32xf32>
    "tpu.trace_start"() <{level = 10 : i32, message = "hmd,hdo->hmo"}> : () -> ()
    %cst_84 = arith.constant dense<0.000000e+00> : vector<2x16x32xf32>
    %131 = tpu.matmul %128, %130, %cst_84 {dimension_numbers = #tpu.dot_dimension_numbers<[2], [1], [1], [2], [0, 0, 0, 1, 1, 2], [0], [0]>} : vector<2x16x16xf32>, vector<2x16x32xf32>, vector<2x16x32xf32> -> vector<2x16x32xf32>
    "tpu.trace_stop"() : () -> ()
    %cst_85 = arith.constant dense<0.000000e+00> : vector<16x32xf32>
    %132 = vector.multi_reduction <add>, %131, %cst_85 [0] : vector<2x16x32xf32> to vector<16x32xf32>
    %133 = arith.addf %132, %101 : vector<16x32xf32>
    %c1_86 = arith.constant 1 : index
    %c0_87 = arith.constant 0 : index
    %c0_88 = arith.constant 0 : index
    %134 = vector.load %arg5[%c1_86, %c0_87, %c0_88] : memref<2x1x32xf32, #tpu.memory_space<vmem>>, vector<1x1x32xf32>
    %135 = vector.shape_cast %134 : vector<1x1x32xf32> to vector<1x32xf32>
    %c1_89 = arith.constant 1 : index
    %c0_90 = arith.constant 0 : index
    %c0_91 = arith.constant 0 : index
    %136 = vector.load %arg6[%c1_89, %c0_90, %c0_91] : memref<2x1x32xf32, #tpu.memory_space<vmem>>, vector<1x1x32xf32>
    %137 = vector.shape_cast %136 : vector<1x1x32xf32> to vector<1x32xf32>
    %cst_92 = arith.constant dense<0.000000e+00> : vector<16xf32>
    %138 = vector.multi_reduction <add>, %133, %cst_92 [1] : vector<16x32xf32> to vector<16xf32>
    %139 = vector.shape_cast %138 : vector<16xf32> to vector<16x1xf32>
    %cst_93 = arith.constant 3.200000e+01 : f32
    %140 = vector.broadcast %cst_93 : f32 to vector<16x1xf32>
    %141 = arith.divf %139, %140 : vector<16x1xf32>
    %142 = vector.broadcast %141 : vector<16x1xf32> to vector<16x32xf32>
    %143 = arith.subf %133, %142 : vector<16x32xf32>
    %144 = arith.mulf %143, %143 : vector<16x32xf32>
    %cst_94 = arith.constant dense<0.000000e+00> : vector<16xf32>
    %145 = vector.multi_reduction <add>, %144, %cst_94 [1] : vector<16x32xf32> to vector<16xf32>
    %146 = vector.shape_cast %145 : vector<16xf32> to vector<16x1xf32>
    %cst_95 = arith.constant 3.200000e+01 : f32
    %147 = vector.broadcast %cst_95 : f32 to vector<16x1xf32>
    %148 = arith.divf %146, %147 : vector<16x1xf32>
    %149 = vector.broadcast %141 : vector<16x1xf32> to vector<16x32xf32>
    %150 = arith.subf %133, %149 : vector<16x32xf32>
    %cst_96 = arith.constant 9.99999997E-7 : f32
    %151 = vector.broadcast %cst_96 : f32 to vector<16x1xf32>
    %152 = arith.addf %148, %151 : vector<16x1xf32>
    %153 = math.rsqrt %152 : vector<16x1xf32>
    %154 = vector.broadcast %153 : vector<16x1xf32> to vector<16x32xf32>
    %155 = arith.mulf %150, %154 : vector<16x32xf32>
    %156 = vector.broadcast %135 : vector<1x32xf32> to vector<16x32xf32>
    %157 = arith.mulf %155, %156 : vector<16x32xf32>
    %158 = vector.broadcast %137 : vector<1x32xf32> to vector<16x32xf32>
    %159 = arith.addf %157, %158 : vector<16x32xf32>
    %c1_97 = arith.constant 1 : index
    %c0_98 = arith.constant 0 : index
    %c0_99 = arith.constant 0 : index
    %160 = vector.load %arg7[%c1_97, %c0_98, %c0_99] : memref<2x32x64xf32, #tpu.memory_space<vmem>>, vector<1x32x64xf32>
    %161 = vector.shape_cast %160 : vector<1x32x64xf32> to vector<32x64xf32>
    %cst_100 = arith.constant dense<0.000000e+00> : vector<16x64xf32>
    %162 = tpu.matmul %159, %161, %cst_100 {dimension_numbers = #tpu.dot_dimension_numbers<[1], [0], [0], [1], [0, 0, 1, 1], [], []>} : vector<16x32xf32>, vector<32x64xf32>, vector<16x64xf32> -> vector<16x64xf32>
    %c1_101 = arith.constant 1 : index
    %c0_102 = arith.constant 0 : index
    %c0_103 = arith.constant 0 : index
    %163 = vector.load %arg8[%c1_101, %c0_102, %c0_103] : memref<2x1x64xf32, #tpu.memory_space<vmem>>, vector<1x1x64xf32>
    %164 = vector.shape_cast %163 : vector<1x1x64xf32> to vector<1x64xf32>
    %165 = vector.broadcast %164 : vector<1x64xf32> to vector<16x64xf32>
    %166 = arith.addf %162, %165 : vector<16x64xf32>
    %cst_104 = arith.constant 0.000000e+00 : f32
    %167 = vector.broadcast %cst_104 : f32 to vector<16x64xf32>
    %168 = arith.maximumf %166, %167 : vector<16x64xf32>
    %c1_105 = arith.constant 1 : index
    %c0_106 = arith.constant 0 : index
    %c0_107 = arith.constant 0 : index
    %169 = vector.load %arg9[%c1_105, %c0_106, %c0_107] : memref<2x64x32xf32, #tpu.memory_space<vmem>>, vector<1x64x32xf32>
    %170 = vector.shape_cast %169 : vector<1x64x32xf32> to vector<64x32xf32>
    %cst_108 = arith.constant dense<0.000000e+00> : vector<16x32xf32>
    %171 = tpu.matmul %168, %170, %cst_108 {dimension_numbers = #tpu.dot_dimension_numbers<[1], [0], [0], [1], [0, 0, 1, 1], [], []>} : vector<16x64xf32>, vector<64x32xf32>, vector<16x32xf32> -> vector<16x32xf32>
    %c1_109 = arith.constant 1 : index
    %c0_110 = arith.constant 0 : index
    %c0_111 = arith.constant 0 : index
    %172 = vector.load %arg10[%c1_109, %c0_110, %c0_111] : memref<2x1x32xf32, #tpu.memory_space<vmem>>, vector<1x1x32xf32>
    %173 = vector.shape_cast %172 : vector<1x1x32xf32> to vector<1x32xf32>
    %174 = vector.broadcast %173 : vector<1x32xf32> to vector<16x32xf32>
    %175 = arith.addf %171, %174 : vector<16x32xf32>
    %176 = arith.addf %175, %159 : vector<16x32xf32>
    %cst_112 = arith.constant dense<0.000000e+00> : vector<16xf32>
    %177 = vector.multi_reduction <add>, %176, %cst_112 [1] : vector<16x32xf32> to vector<16xf32>
    %178 = vector.shape_cast %177 : vector<16xf32> to vector<16x1xf32>
    %cst_113 = arith.constant 3.200000e+01 : f32
    %179 = vector.broadcast %cst_113 : f32 to vector<16x1xf32>
    %180 = arith.divf %178, %179 : vector<16x1xf32>
    %181 = vector.broadcast %180 : vector<16x1xf32> to vector<16x32xf32>
    %182 = arith.subf %176, %181 : vector<16x32xf32>
    %183 = arith.mulf %182, %182 : vector<16x32xf32>
    %cst_114 = arith.constant dense<0.000000e+00> : vector<16xf32>
    %184 = vector.multi_reduction <add>, %183, %cst_114 [1] : vector<16x32xf32> to vector<16xf32>
    %185 = vector.shape_cast %184 : vector<16xf32> to vector<16x1xf32>
    %cst_115 = arith.constant 3.200000e+01 : f32
    %186 = vector.broadcast %cst_115 : f32 to vector<16x1xf32>
    %187 = arith.divf %185, %186 : vector<16x1xf32>
    %188 = vector.broadcast %180 : vector<16x1xf32> to vector<16x32xf32>
    %189 = arith.subf %176, %188 : vector<16x32xf32>
    %cst_116 = arith.constant 9.99999997E-7 : f32
    %190 = vector.broadcast %cst_116 : f32 to vector<16x1xf32>
    %191 = arith.addf %187, %190 : vector<16x1xf32>
    %192 = math.rsqrt %191 : vector<16x1xf32>
    %193 = vector.broadcast %192 : vector<16x1xf32> to vector<16x32xf32>
    %194 = arith.mulf %189, %193 : vector<16x32xf32>
    %c0_117 = arith.constant 0 : index
    %c0_118 = arith.constant 0 : index
    %195 = vector.load %arg13[%c0_117, %c0_118] : memref<32x128xf32, #tpu.memory_space<vmem>>, vector<32x128xf32>
    %cst_119 = arith.constant dense<0.000000e+00> : vector<16x128xf32>
    %196 = tpu.matmul %194, %195, %cst_119 {dimension_numbers = #tpu.dot_dimension_numbers<[1], [0], [0], [1], [0, 0, 1, 1], [], []>} : vector<16x32xf32>, vector<32x128xf32>, vector<16x128xf32> -> vector<16x128xf32>
    %c0_120 = arith.constant 0 : index
    %c0_121 = arith.constant 0 : index
    %197 = vector.load %arg14[%c0_120, %c0_121] : memref<1x128xf32, #tpu.memory_space<vmem>>, vector<1x128xf32>
    %198 = vector.broadcast %197 : vector<1x128xf32> to vector<16x128xf32>
    %199 = arith.addf %196, %198 : vector<16x128xf32>
    %c0_122 = arith.constant 0 : index
    %c0_123 = arith.constant 0 : index
    %200 = vector.load %arg15[%c0_122, %c0_123] : memref<16x128xf32, #tpu.memory_space<vmem>>, vector<16x128xf32>
    tpu.vector_store %arg15[%c0_122, %c0_123], %199 {strides = array<i32>} : memref<16x128xf32, #tpu.memory_space<vmem>>, vector<16x128xf32>,
    return
  }
}

</mosaic_0001>

<bundles_post_ra>
// kernel: _lambda_.1
= control target key start
LH: loop header
LB: loop body
LE: loop exit
PB: predicated region body
PF: predicated region fallthrough
CT: control target
= control target key end

     0   :  { %vm60_vm0 = vcmask 261120   ;;  %vm221_vm1 = vcmask 130048   ;;  %vm326_vm2 = vcmask 64512   ;;  %s2300_s1 = inlined_call_operand.vmem [shape: f32[2,2,32,16], index: 1, kind: input, shape index: {}]   ;;  %s2301_s0 = inlined_call_operand.vmem [shape: f32[16,32], index: 0, kind: input, shape index: {}]   ;;  %s2302_s2 = inlined_call_operand.vmem [shape: f32[2,2,32,16], index: 2, kind: input, shape index: {}]   ;;  %s2303_s3 = inlined_call_operand.vmem [shape: f32[2,2,32,16], index: 3, kind: input, shape index: {}]   ;;  %s2304_s4 = inlined_call_operand.vmem [shape: f32[2,2,16,32], index: 4, kind: input, shape index: {}]   ;;  %s2305_s5 = inlined_call_operand.vmem [shape: f32[2,1,32], index: 5, kind: input, shape index: {}]   ;;  %s2306_s6 = inlined_call_operand.vmem [shape: f32[2,1,32], index: 6, kind: input, shape index: {}]   ;;  %s2307_s8 = inlined_call_operand.vmem [shape: f32[2,1,64], index: 8, kind: input, shape index: {}]   ;;  %s2308_s7 = inlined_call_operand.vmem [shape: f32[2,32,64], index: 7, kind: input, shape index: {}]   ;;  %s2309_s9 = inlined_call_operand.vmem [shape: f32[2,64,32], index: 9, kind: input, shape index: {}]   ;;  %s2310_s10 = inlined_call_operand.vmem [shape: f32[2,1,32], index: 10, kind: input, shape index: {}]   ;;  %s2311_s11 = inlined_call_operand.vmem [shape: f32[2,1,32], index: 11, kind: input, shape index: {}]   ;;  %s2312_s12 = inlined_call_operand.vmem [shape: f32[2,1,32], index: 12, kind: input, shape index: {}]   ;;  %s2313_s14 = inlined_call_operand.vmem [shape: f32[1,128], index: 14, kind: input, shape index: {}]   ;;  %s2314_s13 = inlined_call_operand.vmem [shape: f32[32,128], index: 13, kind: input, shape index: {}]   ;;  %s2315_s15 = inlined_call_operand.vmem [shape: f32[16,128], index: 15, kind: output, shape index: {}]  }
   0x1   :  { %v55_v0 = vld [vmem:[%s2300_s1 + $0x18] sm:$0xff]  ;;  %v54_v1 = vld [vmem:[%s2300_s1 + $0x10] sm:$0xff]  ;;  %v53_v3 = vld [vmem:[%s2300_s1 + $0x8] sm:$0xff] }
   0x2   :  { %1662 = vmatpush.msra.mxu2 %v55_v0  ;;  %v59_v2 = vld [vmem:[%s2300_s1 + $0x38] sm:$0xff]  ;;  %79 = vmatpush.msra.mxu0 %v55_v0  ;;  %v58_v4 = vld [vmem:[%s2300_s1 + $0x30] sm:$0xff]  ;;  %v57_v5 = vld [vmem:[%s2300_s1 + $0x28] sm:$0xff] }
   0x3   :  { %1666 = vmatpush.msra.mxu3 %v59_v2  ;;  %102 = vmatpush.msra.mxu1 %v59_v2  ;;  %v52_v6 = vld [vmem:[%s2300_s1] sm:$0xff]  ;;  %v1837_v7 = vld [vmem:[%s2301_s0 + $0x8] sm:$0xff]  ;;  %v116_v9 = vld [vmem:[%s2302_s2 + $0x18] sm:$0xff] }
   0x4   :  { %1663 = vmatpush.msra.mxu2 %v54_v1  ;;  %80 = vmatpush.msra.mxu0 %v54_v1  ;;  %v56_v8 = vld [vmem:[%s2300_s1 + $0x20] sm:$0xff]  ;;  %v120_v10 = vld [vmem:[%s2302_s2 + $0x38] sm:$0xff]  ;;  %v115_v11 = vld [vmem:[%s2302_s2 + $0x10] sm:$0xff] }
   0x5   :  { %1667 = vmatpush.msra.mxu3 %v58_v4  ;;  %103 = vmatpush.msra.mxu1 %v58_v4  ;;  %v1858_v12 = vld [vmem:[%s2301_s0] sm:$0xff]  ;;  %v119_v13 = vld [vmem:[%s2302_s2 + $0x30] sm:$0xff]  ;;  %v114_v14 = vld [vmem:[%s2302_s2 + $0x8] sm:$0xff] }
   0x6   :  { %1664 = vmatpush.msra.mxu2 %v53_v3  ;;  %81 = vmatpush.msra.mxu0 %v53_v3  ;;  %v118_v15 = vld [vmem:[%s2302_s2 + $0x28] sm:$0xff]  ;;  %v113_v16 = vld [vmem:[%s2302_s2] sm:$0xff]  ;;  %v174_v34 = vld [vmem:[%s2303_s3 + $0x38] sm:$0xff] }
   0x7   :  { %1668 = vmatpush.msra.mxu3 %v57_v5  ;;  %104 = vmatpush.msra.mxu1 %v57_v5  ;;  %v117_v17 = vld [vmem:[%s2302_s2 + $0x20] sm:$0xff]  ;;  %v173_v35 = vld [vmem:[%s2303_s3 + $0x30] sm:$0xff]  ;;  %v172_v36 = vld [vmem:[%s2303_s3 + $0x28] sm:$0xff] }
   0x8   :  { %1665 = vmatpush.msra.mxu2 %v52_v6  ;;  %82 = vmatpush.msra.mxu0 %v52_v6  ;;  %v171_v37 = vld [vmem:[%s2303_s3 + $0x20] sm:$0xff]  ;;  %v170_v38 = vld [vmem:[%s2303_s3 + $0x18] sm:$0xff]  ;;  %v169_v39 = vld [vmem:[%s2303_s3 + $0x10] sm:$0xff] }
   0x9   :  { %1553 = vmatmul.msk.f32.vlgmr.msra.gmra.mxu2 %vm60_vm0, %v1837_v7  ;;  %1669 = vmatpush.msra.mxu3 %v56_v8  ;;  %v168_v40 = vld [vmem:[%s2303_s3 + $0x8] sm:$0xff]  ;;  %v167_v41 = vld [vmem:[%s2303_s3] sm:$0xff]  ;;  %v518_v3 = vld [vmem:[%s2304_s4 + $0x18] sm:$0xff] }
   0xa   :  { %133 = vmatpush.msrb.mxu2 %v116_v9  ;;  %1555 = vmatmul.msk.f32.vlgmr.msra.gmra.mxu3 %vm60_vm0, %v1837_v7 }
   0xb   :  { %156 = vmatpush.msrb.mxu3 %v120_v10  ;;  %1552 = vmatmul.msk.f32.vlgmr.msra.gmra.mxu0 %vm60_vm0, %v1858_v12 }
   0xc   :  { %134 = vmatpush.msrb.mxu2 %v115_v11  ;;  %105 = vmatpush.msra.mxu1 %v56_v8 }
   0xd   :  { %157 = vmatpush.msrb.mxu3 %v119_v13  ;;  %1554 = vmatmul.msk.f32.vlgmr.msra.gmra.mxu1 %vm60_vm0, %v1858_v12 }
   0xe   :  { %135 = vmatpush.msrb.mxu2 %v114_v14  ;;  %210 = vmatpush.msrb.mxu1 %v174_v34 }
   0xf   :  { %158 = vmatpush.msrb.mxu3 %v118_v15  ;;  %187 = vmatpush.msrb.mxu0 %v170_v38 }
  0x10   :  { %136 = vmatpush.msrb.mxu2 %v113_v16  ;;  %211 = vmatpush.msrb.mxu1 %v173_v35 }
  0x11   :  { %1556 = vmatmul.msk.f32.vlgmr.msrb.gmra.mxu2 %vm60_vm0, %v1858_v12  ;;  %159 = vmatpush.msrb.mxu3 %v117_v17 }
  0x12   :  { %1558 = vmatmul.msk.f32.vlgmr.msrb.gmra.mxu3 %vm60_vm0, %v1858_v12  ;;  %212 = vmatpush.msrb.mxu1 %v172_v36 }
  0x13   :  { %188 = vmatpush.msrb.mxu0 %v169_v39 }
  0x14   :  { %213 = vmatpush.msrb.mxu1 %v171_v37 }
  0x15   :  { %1562 = vmatmul.msk.f32.vlgmr.msrb.gmra.mxu1 %vm60_vm0, %v1858_v12  ;;  %189 = vmatpush.msrb.mxu0 %v168_v40 }
  0x17   :  { %190 = vmatpush.msrb.mxu0 %v167_v41 }
  0x18   :  { %1560 = vmatmul.msk.f32.vlgmr.msrb.gmra.mxu0 %vm60_vm0, %v1858_v12 }
  0x19   :  { %1557 = vmatmul.msk.f32.gmra.mxu2 %vm60_vm0, %v1837_v7 }
  0x1a   :  { %1559 = vmatmul.msk.f32.gmra.mxu3 %vm60_vm0, %v1837_v7 }
  0x1d   :  { %1563 = vmatmul.msk.f32.gmra.mxu1 %vm60_vm0, %v1837_v7 }
  0x20   :  { %1561 = vmatmul.msk.f32.gmra.mxu0 %vm60_vm0, %v1837_v7 }
  0x88   :  { %v84_v21 = vpop.f32.mrf.mxu0 }
  0x8a   :  { %v107_v24 = vpop.f32.mrf.mxu1 }
  0x8c   :  { %v87_v18 = vpop.f32.mrf.mxu2 }
  0x8d   :  { %v110_v19 = vpop.f32.mrf.mxu3 }
  0x92   :  { %v215_v62 = vpop.f32.mrf.mxu1 }
  0x94   :  { %v138_v20 = vpop.f32.mrf.mxu2 }
  0x95   :  { %1564 = vmatpush.xpose.msk.msra.mxu2 %vm221_vm1, %v138_v20  ;;  %v161_v22 = vpop.f32.mrf.mxu3  ;;  %v192_v63 = vpop.f32.mrf.mxu0 }
  0x96   :  { %441 = vmatpush.msra.mxu0 %v192_v63 }
  0x98   :  { %1565 = vmatmul.msk.f32.vlgmr.msra.gmra.mxu2 %vm221_vm1, %v84_v21 }
  0x99   :  { %1568 = vmatpush.xpose.msk.msrb.mxu2 %vm221_vm1, %v161_v22 }
  0x9a   :  { %v218_v0 = vpop.f32.mrf.mxu1 }
  0x9c   :  { %v141_v23 = vpop.f32.mrf.mxu2 }
  0x9d   :  { %1566 = vmatpush.xpose.msk.msra.mxu3 %vm221_vm1, %v141_v23  ;;  %v164_v25 = vpop.f32.mrf.mxu3  ;;  %487 = vmatpush.msra.mxu2 %v215_v62  ;;  %v195_v2 = vpop.f32.mrf.mxu0 }
  0x9e   :  { %464 = vmatpush.msra.mxu1 %v195_v2 }
  0xa0   :  { %1567 = vmatmul.msk.f32.vlgmr.msra.gmra.mxu3 %vm221_vm1, %v87_v18  ;;  %1569 = vmatmul.msk.f32.vlgmr.msrb.gmra.mxu2 %vm221_vm1, %v107_v24 }
  0xa1   :  { %1570 = vmatpush.xpose.msk.msrb.mxu3 %vm221_vm1, %v164_v25  ;;  %568 = vmatpush.msrb.mxu1 %v518_v3 }
  0xa5   :  { %510 = vmatpush.msra.mxu3 %v218_v0 }
  0xa8   :  { %1571 = vmatmul.msk.f32.vlgmr.msrb.gmra.mxu3 %vm221_vm1, %v110_v19 }
 0x11b   :  { %v245_v26 = vpop.f32.mrf.mxu2 }
 0x11c   :  { %v327_v32 = vsel %vm326_vm2, %v245_v26, -inf }
 0x123   :  { %v271_v27 = vpop.f32.mrf.mxu3  ;;  %v297_v28 = vpop.f32.mrf.mxu2 }
 0x124   :  { %v333_v29 = vsel %vm326_vm2, %v297_v28, -inf  ;;  %v330_v33 = vsel %vm326_vm2, %v271_v27, -inf }
 0x125   :  { %334 = vmax.xlane.f32.xlu0 %v333_v29 }
 0x12b   :  { %v323_v30 = vpop.f32.mrf.mxu3 }
 0x12c   :  { %v336_v31 = vsel %vm326_vm2, %v323_v30, -inf }
 0x12d   :  { %337 = vmax.xlane.f32.xlu1 %v336_v31  ;;  %328 = vmax.xlane.f32.xlu0 %v327_v32 }
 0x135   :  { %331 = vmax.xlane.f32.xlu1 %v330_v33 }
 0x198   :  { %v335_v42 = vpop.xlane.xlu0 %334 }
 0x199   :  { %v341_v43 = vsub.f32 %v297_v28, %v335_v42 }
 0x19b   :  { %v347_v44 = vmul.f32 1.442695, %v341_v43 }
 0x19d   :  { %1682 = vpow2.f32 %v347_v44 }
 0x1a0   :  { %v338_v45 = vpop.xlane.xlu1 %337  ;;  %v329_v46 = vpop.xlane.xlu0 %328 }
 0x1a1   :  { %v342_v47 = vsub.f32 %v323_v30, %v338_v45  ;;  %v339_v48 = vsub.f32 %v245_v26, %v329_v46 }
 0x1a3   :  { %v1683_v49 = vpop.eup %1682  ;;  %v349_v50 = vmul.f32 1.442695, %v342_v47  ;;  %v343_v51 = vmul.f32 1.442695, %v339_v48 }
 0x1a4   :  { %v357_v52 = vsel %vm326_vm2, %v1683_v49, 0.0 }
 0x1a5   :  { %1684 = vpow2.f32 %v349_v50  ;;  %358 = vadd.xlane.f32.xlu2 %v357_v52 }
 0x1a6   :  { %1686 = vpow2.f32 %v343_v51 }
 0x1a8   :  { %v332_v53 = vpop.xlane.xlu1 %331 }
 0x1a9   :  { %v340_v54 = vsub.f32 %v271_v27, %v332_v53  ;;  %v516_v53 = vld [vmem:[%s2304_s4 + $0x8] sm:$0xff] }
 0x1aa   :  { %539 = vmatpush.msrb.mxu0 %v516_v53 }
 0x1ab   :  { %v1932_v55 = vpop.eup %1684  ;;  %v345_v56 = vmul.f32 1.442695, %v340_v54  ;;  %v517_v54 = vld [vmem:[%s2304_s4 + $0x10] sm:$0xff] }
 0x1ac   :  { %v1934_v57 = vpop.eup %1686  ;;  %v360_v58 = vsel %vm326_vm2, %v1932_v55, 0.0  ;;  %569 = vmatpush.msrb.mxu1 %v517_v54  ;;  %v1672_v54 = vld [vmem:[%s2306_s6] ss:$0 sm:$0xff] }
 0x1ad   :  { %1688 = vpow2.f32 %v345_v56  ;;  %361 = vadd.xlane.f32.xlu0 %v360_v58  ;;  %v351_v59 = vsel %vm326_vm2, %v1934_v57, 0.0 }
 0x1ae   :  { %352 = vadd.xlane.f32.xlu2 %v351_v59 }
 0x1b3   :  { %v1940_v60 = vpop.eup %1688 }
 0x1b4   :  { %v354_v61 = vsel %vm326_vm2, %v1940_v60, 0.0 }
 0x1b5   :  { %355 = vadd.xlane.f32.xlu1 %v354_v61 }
 0x218   :  { %v359_v1 = vpop.xlane.xlu2 %358 }
 0x219   :  { %1690 = vrcp.f32 %v359_v1  ;;  %v404_v10 = vand.u32 2147483648, %v359_v1  ;;  %v402_v13 = vand.u32 2147483647, %v359_v1  ;;  %vm398_vm4 = vweird.f32 %v359_v1 }
 0x21b   :  { %v405_v16 = vor.u32 1.1754944e-38, %v404_v10  ;;  %vm403_vm6 = vcmp.eq.f32.partialorder %v402_v13, 8.507059e+37 }
 0x21f   :  { %v1691_v4 = vpop.eup %1690 }
 0x220   :  { %v394_v5 = vmul.f32 %v1691_v4, %v359_v1  ;;  %v362_v6 = vpop.xlane.xlu0 %361  ;;  %vm399_vm3 = vweird.f32 %v1691_v4 }
 0x221   :  { %v353_v8 = vpop.xlane.xlu2 %352  ;;  %1692 = vrcp.f32 %v362_v6  ;;  %vm400_vm5 = vmor %vm398_vm4, %vm399_vm3  ;;  %v419_v25 = vand.u32 2147483648, %v362_v6  ;;  %v417_v29 = vand.u32 2147483647, %v362_v6  ;;  %vm413_vm9 = vweird.f32 %v362_v6 }
 0x222   :  { %v395_v9 = vsub.f32 1.0, %v394_v5  ;;  %1694 = vrcp.f32 %v353_v8  ;;  %v374_v27 = vand.u32 2147483648, %v353_v8  ;;  %v372_v31 = vand.u32 2147483647, %v353_v8 }
 0x223   :  { %vm368_vm10 = vweird.f32 %v353_v8  ;;  %v420_v35 = vor.u32 1.1754944e-38, %v419_v25  ;;  %vm418_vm13 = vcmp.eq.f32.partialorder %v417_v29, 8.507059e+37  ;;  %v649_v29 = vld [vmem:[%s2308_s7 + $0x8] sm:$0xff] }
 0x224   :  { %v396_v11 = vmul.f32 %v1691_v4, %v395_v9  ;;  %v375_v36 = vor.u32 1.1754944e-38, %v374_v27  ;;  %vm373_vm14 = vcmp.eq.f32.partialorder %v372_v31, 8.507059e+37  ;;  %v651_v27 = vld [vmem:[%s2308_s7 + $0x18] sm:$0xff] }
 0x225   :  { %674 = vmatpush.msrb.mxu2 %v651_v27 }
 0x226   :  { %v397_v14 = vadd.f32 %v1691_v4, %v396_v11  ;;  %v1732_v11 = vmov 32.0  }
 0x227   :  { %v1693_v15 = vpop.eup %1692 }
 0x228   :  { %v1695_v17 = vpop.eup %1694  ;;  %v401_v18 = vsel %vm400_vm5, %v1691_v4, %v397_v14  ;;  %v409_v19 = vmul.f32 %v1693_v15, %v362_v6  ;;  %v356_v20 = vpop.xlane.xlu1 %355  ;;  %vm414_vm7 = vweird.f32 %v1693_v15 }
 0x229   :  { %v406_v21 = vsel %vm403_vm6, %v405_v16, %v401_v18  ;;  %v364_v22 = vmul.f32 %v1695_v17, %v353_v8  ;;  %1696 = vrcp.f32 %v356_v20  ;;  %vm369_vm8 = vweird.f32 %v1695_v17  ;;  %vm415_vm11 = vmor %vm413_vm9, %vm414_vm7 }
 0x22a   :  { %v410_v23 = vsub.f32 1.0, %v409_v19  ;;  %v407_v26 = vmul.f32 %v1683_v49, %v406_v21  ;;  %vm370_vm12 = vmor %vm368_vm10, %vm369_vm8  ;;  %v389_v44 = vand.u32 2147483648, %v356_v20  ;;  %v387_v47 = vand.u32 2147483647, %v356_v20 }
 0x22b   :  { %v365_v24 = vsub.f32 1.0, %v364_v22  ;;  %vm383_vm3 = vweird.f32 %v356_v20  ;;  %1698 = vrcp.f32 %v1732_v11  ;;  %v1674_v11 = vld [vmem:[%s2310_s10] ss:$0 sm:$0xff] }
 0x22c   :  { %v411_v28 = vmul.f32 %v1693_v15, %v410_v23  ;;  %1574 = vmatmul.msk.f32.vlgmr.msra.gmra.mxu2 %vm326_vm2, %v407_v26  ;;  %v390_v49 = vor.u32 1.1754944e-38, %v389_v44  ;;  %vm388_vm5 = vcmp.eq.f32.partialorder %v387_v47, 8.507059e+37 }
 0x22d   :  { %v366_v30 = vmul.f32 %v1695_v17, %v365_v24 }
 0x22e   :  { %v412_v32 = vadd.f32 %v1693_v15, %v411_v28  ;;  %v650_v28 = vld [vmem:[%s2308_s7 + $0x10] sm:$0xff] }
 0x22f   :  { %v1697_v33 = vpop.eup %1696  ;;  %v367_v34 = vadd.f32 %v1695_v17, %v366_v30  ;;  %675 = vmatpush.msrb.mxu2 %v650_v28  ;;  %v648_v30 = vld [vmem:[%s2308_s7] sm:$0xff] }
 0x230   :  { %v416_v37 = vsel %vm415_vm11, %v1693_v15, %v412_v32  ;;  %v379_v38 = vmul.f32 %v1697_v33, %v356_v20  ;;  %vm384_vm15 = vweird.f32 %v1697_v33 }
 0x231   :  { %v371_v39 = vsel %vm370_vm12, %v1695_v17, %v367_v34  ;;  %v421_v40 = vsel %vm418_vm13, %v420_v35, %v416_v37  ;;  %vm385_vm4 = vmor %vm383_vm3, %vm384_vm15  ;;  %v1699_v13 = vpop.eup %1698  ;;  %676 = vmatpush.msrb.mxu2 %v649_v29  ;;  %v694_v34 = vld [vmem:[%s2309_s9 + $0x38] sm:$0xff]  ;;  %v693_v35 = vld [vmem:[%s2309_s9 + $0x30] sm:$0xff]  ;;  %vm699_vm13 = vcmask 523264  }
 0x232   :  { %v376_v41 = vsel %vm373_vm14, %v375_v36, %v371_v39  ;;  %v380_v42 = vsub.f32 1.0, %v379_v38  ;;  %v422_v43 = vmul.f32 %v1932_v55, %v421_v40  ;;  %v515_v55 = vld [vmem:[%s2304_s4] sm:$0xff]  ;;  %v594_v14 = vmul.f32 32.0, %v1699_v13  ;;  %714 = vmatpush.msrb.mxu3 %v694_v34  ;;  %v692_v36 = vld [vmem:[%s2309_s9 + $0x28] sm:$0xff]  ;;  %v1586_v34 = vld [vmem:[%s2300_s1 + $0x50] sm:$0xff] }
 0x233   :  { %v377_v45 = vmul.f32 %v1934_v57, %v376_v41  ;;  %540 = vmatpush.msrb.mxu0 %v515_v55  ;;  %vm598_vm6 = vweird.f32 %v1699_v13  ;;  %677 = vmatpush.msrb.mxu2 %v648_v30  ;;  %v691_v39 = vld [vmem:[%s2309_s9 + $0x20] sm:$0xff]  ;;  %v1587_v30 = vld [vmem:[%s2300_s1 + $0x58] sm:$0xff] }
 0x234   :  { %v381_v46 = vmul.f32 %v1697_v33, %v380_v42  ;;  %1575 = vmatmul.msk.f32.vlgmr.msra.gmra.mxu3 %vm326_vm2, %v422_v43  ;;  %v690_v42 = vld [vmem:[%s2309_s9 + $0x18] sm:$0xff] }
 0x235   :  { %1572 = vmatmul.msk.f32.vlgmr.msra.gmra.mxu0 %vm326_vm2, %v377_v45  ;;  %715 = vmatpush.msrb.mxu3 %v693_v35  ;;  %v1590_v35 = vld [vmem:[%s2300_s1 + $0x70] sm:$0xff] }
 0x236   :  { %v382_v48 = vadd.f32 %v1697_v33, %v381_v46  ;;  %814 = vmatpush.msra.mxu0 %v1587_v30 }
 0x237   :  { %716 = vmatpush.msrb.mxu3 %v692_v36  ;;  %v1598_v36 = vld [vmem:[%s2302_s2 + $0x50] sm:$0xff] }
 0x238   :  { %v386_v50 = vsel %vm385_vm4, %v1697_v33, %v382_v48  ;;  %815 = vmatpush.msra.mxu0 %v1586_v34 }
 0x239   :  { %v391_v51 = vsel %vm388_vm5, %v390_v49, %v386_v50  ;;  %717 = vmatpush.msrb.mxu3 %v691_v39  ;;  %v1671_v50 = vld [vmem:[%s2305_s5] ss:$0 sm:$0xff]  ;;  %v1589_v39 = vld [vmem:[%s2300_s1 + $0x68] sm:$0xff] }
 0x23a   :  { %v392_v52 = vmul.f32 %v1940_v60, %v391_v51 }
 0x23b   :  { %718 = vmatpush.msrb.mxu3 %v690_v42  ;;  %v1584_v42 = vld [vmem:[%s2300_s1 + $0x40] sm:$0xff] }
 0x23c   :  { %1573 = vmatmul.msk.f32.vlgmr.msra.gmra.mxu1 %vm326_vm2, %v392_v52 }
 0x2af   :  { %v489_v56 = vpop.f32.mrf.mxu2 }
 0x2b0   :  { %1578 = vmatmul.msk.f32.vlgmr.msrb.gmra.mxu1 %vm221_vm1, %v489_v56 }
 0x2b2   :  { %v443_v57 = vpop.f32.mrf.mxu0 }
 0x2b3   :  { %1576 = vmatmul.msk.f32.vlgmr.msrb.gmra.mxu0 %vm221_vm1, %v443_v57 }
 0x2b7   :  { %v512_v58 = vpop.f32.mrf.mxu3 }
 0x2b8   :  { %1579 = vmatmul.msk.f32.gmra.mxu1 %vm221_vm1, %v512_v58 }
 0x2b9   :  { %v466_v59 = vpop.f32.mrf.mxu1 }
 0x2bb   :  { %1577 = vmatmul.msk.f32.gmra.mxu0 %vm221_vm1, %v466_v59 }
 0x32d   :  { %v571_v60 = vpop.f32.mrf.mxu1 }
 0x32e   :  { %v578_v62 = vsel %vm60_vm0, %v571_v60, 0.0 }
 0x330   :  { %v542_v61 = vpop.f32.mrf.mxu0 }
 0x331   :  { %v577_v63 = vsel %vm60_vm0, %v542_v61, 0.0 }
 0x332   :  { %v579_v0 = vadd.f32 %v578_v62, %v577_v63 }
 0x334   :  { %v583_v1 = vadd.f32 %v579_v0, %v1858_v12  ;;  %v595_v12 = vsub.f32 1.0, %v594_v14  ;;  %v689_v0 = vld [vmem:[%s2309_s9 + $0x10] sm:$0xff] }
 0x335   :  { %v574_v2 = vpop.f32.mrf.mxu1  ;;  %719 = vmatpush.msrb.mxu3 %v689_v0 }
 0x336   :  { %v587_v3 = vsel %vm60_vm0, %v583_v1, 0.0  ;;  %v581_v5 = vsel %vm60_vm0, %v574_v2, 0.0  ;;  %v596_v15 = vmul.f32 %v1699_v13, %v595_v12  ;;  %v687_v2 = vld [vmem:[%s2309_s9] sm:$0xff] }
 0x337   :  { %588 = vadd.xlane.f32.xlu2 %v587_v3  ;;  %v1673_v3 = vld [vmem:[%s2307_s8] ss:$0 sm:$0xff] }
 0x338   :  { %v545_v4 = vpop.f32.mrf.mxu0  ;;  %v597_v16 = vadd.f32 %v1699_v13, %v596_v15 }
 0x339   :  { %v580_v6 = vsel %vm60_vm0, %v545_v4, 0.0 }
 0x33a   :  { %v582_v8 = vadd.f32 %v581_v5, %v580_v6  ;;  %v1975_v17 = vsel %vm598_vm6, %v1699_v13, %v597_v16 }
 0x33c   :  { %v584_v9 = vadd.f32 %v582_v8, %v1837_v7 }
 0x33e   :  { %v590_v10 = vsel %vm60_vm0, %v584_v9, 0.0 }
 0x33f   :  { %591 = vadd.xlane.f32.xlu0 %v590_v10 }
 0x3aa   :  { %v589_v18 = vpop.xlane.xlu2 %588 }
 0x3ab   :  { %v600_v19 = vmul.f32 %v1975_v17, %v589_v18 }
 0x3ad   :  { %v602_v20 = vsub.f32 %v583_v1, %v600_v19  ;;  %v688_v1 = vld [vmem:[%s2309_s9 + $0x8] sm:$0xff] }
 0x3ae   :  { %720 = vmatpush.msrb.mxu3 %v688_v1 }
 0x3af   :  { %v604_v21 = vmul.f32 %v602_v20, %v602_v20 }
 0x3b0   :  { %721 = vmatpush.msrb.mxu3 %v687_v2 }
 0x3b1   :  { %v606_v7 = vsel %vm60_vm0, %v604_v21, 0.0 }
 0x3b2   :  { %607 = vadd.xlane.f32.xlu1 %v606_v7  ;;  %v592_v22 = vpop.xlane.xlu0 %591 }
 0x3b3   :  { %v601_v23 = vmul.f32 %v1975_v17, %v592_v22 }
 0x3b5   :  { %v603_v24 = vsub.f32 %v584_v9, %v601_v23 }
 0x3b7   :  { %v605_v25 = vmul.f32 %v603_v24, %v603_v24 }
 0x3b9   :  { %v609_v26 = vsel %vm60_vm0, %v605_v25, 0.0 }
 0x3ba   :  { %610 = vadd.xlane.f32.xlu2 %v609_v26 }
 0x425   :  { %v608_v31 = vpop.xlane.xlu1 %607 }
 0x426   :  { %v612_v32 = vmul.f32 %v608_v31, %v1975_v17  ;;  %v1591_v31 = vld [vmem:[%s2300_s1 + $0x78] sm:$0xff] }
 0x427   :  { %837 = vmatpush.msra.mxu1 %v1591_v31 }
 0x428   :  { %v614_v33 = vadd.f32 1e-06, %v612_v32  ;;  %v1599_v32 = vld [vmem:[%s2302_s2 + $0x58] sm:$0xff] }
 0x429   :  { %869 = vmatpush.msra.mxu2 %v1599_v32  ;;  %838 = vmatpush.msra.mxu1 %v1590_v35 }
 0x42a   :  { %1700 = vrsqrt.f32 %v614_v33  ;;  %vm622_vm8 = vweird.f32 %v614_v33 }
 0x42b   :  { %870 = vmatpush.msra.mxu2 %v1598_v36  ;;  %839 = vmatpush.msra.mxu1 %v1589_v39 }
 0x42d   :  { %v611_v37 = vpop.xlane.xlu2 %610 }
 0x42e   :  { %v613_v38 = vmul.f32 %v611_v37, %v1975_v17  ;;  %v1602_v37 = vld [vmem:[%s2302_s2 + $0x70] sm:$0xff] }
 0x430   :  { %v1701_v40 = vpop.eup %1700  ;;  %v615_v41 = vadd.f32 1e-06, %v613_v38  ;;  %v1585_v38 = vld [vmem:[%s2300_s1 + $0x48] sm:$0xff] }
 0x431   :  { %v617_v43 = vmul.f32 %v1701_v40, %v614_v33  ;;  %vm623_vm7 = vweird.f32 %v1701_v40  ;;  %v1603_v33 = vld [vmem:[%s2302_s2 + $0x78] sm:$0xff]  ;;  %816 = vmatpush.msra.mxu0 %v1585_v38 }
 0x432   :  { %1702 = vrsqrt.f32 %v615_v41  ;;  %vm624_vm9 = vmor %vm622_vm8, %vm623_vm7  ;;  %vm632_vm11 = vweird.f32 %v615_v41  ;;  %892 = vmatpush.msra.mxu3 %v1603_v33 }
 0x433   :  { %v618_v44 = vmul.f32 %v1701_v40, %v617_v43  ;;  %v1588_v43 = vld [vmem:[%s2300_s1 + $0x60] sm:$0xff]  ;;  %817 = vmatpush.msra.mxu0 %v1584_v42 }
 0x434   :  { %893 = vmatpush.msra.mxu3 %v1602_v37  ;;  %840 = vmatpush.msra.mxu1 %v1588_v43 }
 0x435   :  { %v619_v45 = vmul.f32 0.5, %v618_v44  ;;  %v1596_v44 = vld [vmem:[%s2302_s2 + $0x40] sm:$0xff] }
 0x437   :  { %v620_v46 = vsub.f32 1.5, %v619_v45  ;;  %v1600_v45 = vld [vmem:[%s2302_s2 + $0x60] sm:$0xff] }
 0x438   :  { %v1703_v47 = vpop.eup %1702 }
 0x439   :  { %v621_v48 = vmul.f32 %v1701_v40, %v620_v46  ;;  %v627_v49 = vmul.f32 %v1703_v47, %v615_v41  ;;  %vm633_vm10 = vweird.f32 %v1703_v47  ;;  %v1601_v41 = vld [vmem:[%s2302_s2 + $0x68] sm:$0xff] }
 0x43a   :  { %vm634_vm12 = vmor %vm632_vm11, %vm633_vm10  ;;  %894 = vmatpush.msra.mxu3 %v1601_v41 }
 0x43b   :  { %v625_v51 = vsel %vm624_vm9, %v1701_v40, %v621_v48  ;;  %v628_v52 = vmul.f32 %v1703_v47, %v627_v49  ;;  %v1597_v40 = vld [vmem:[%s2302_s2 + $0x48] sm:$0xff]  ;;  %v1611_v49 = vld [vmem:[%s2303_s3 + $0x58] sm:$0xff] }
 0x43c   :  { %v636_v53 = vmul.f32 %v625_v51, %v602_v20  ;;  %871 = vmatpush.msra.mxu2 %v1597_v40  ;;  %895 = vmatpush.msra.mxu3 %v1600_v45  ;;  %v1610_v51 = vld [vmem:[%s2303_s3 + $0x50] sm:$0xff] }
 0x43d   :  { %v629_v55 = vmul.f32 0.5, %v628_v52  ;;  %924 = vmatpush.msrb.mxu0 %v1611_v49  ;;  %v1614_v52 = vld [vmem:[%s2303_s3 + $0x70] sm:$0xff] }
 0x43e   :  { %v641_v56 = vmul.f32 %v1671_v50, %v636_v53  ;;  %872 = vmatpush.msra.mxu2 %v1596_v44 }
 0x43f   :  { %v630_v57 = vsub.f32 1.5, %v629_v55  ;;  %v1613_v55 = vld [vmem:[%s2303_s3 + $0x68] sm:$0xff]  ;;  %925 = vmatpush.msrb.mxu0 %v1610_v51 }
 0x440   :  { %v646_v58 = vadd.f32 %v1672_v54, %v641_v56 }
 0x441   :  { %v631_v59 = vmul.f32 %v1703_v47, %v630_v57  ;;  %v1608_v57 = vld [vmem:[%s2303_s3 + $0x40] sm:$0xff] }
 0x442   :  { %1580 = vmatmul.msk.f32.vlgmr.msrb.gmra.mxu2 %vm60_vm0, %v646_v58 }
 0x443   :  { %v635_v60 = vsel %vm634_vm12, %v1703_v47, %v631_v59 }
 0x444   :  { %v637_v61 = vmul.f32 %v635_v60, %v603_v24 }
 0x446   :  { %v642_v62 = vmul.f32 %v1671_v50, %v637_v61  ;;  %v1615_v50 = vld [vmem:[%s2303_s3 + $0x78] sm:$0xff] }
 0x447   :  { %947 = vmatpush.msrb.mxu1 %v1615_v50 }
 0x448   :  { %v647_v63 = vadd.f32 %v1672_v54, %v642_v62  ;;  %v1609_v54 = vld [vmem:[%s2303_s3 + $0x48] sm:$0xff] }
 0x449   :  { %948 = vmatpush.msrb.mxu1 %v1614_v52  ;;  %926 = vmatpush.msrb.mxu0 %v1609_v54 }
 0x44a   :  { %1581 = vmatmul.msk.f32.gmra.mxu2 %vm60_vm0, %v647_v63 }
 0x44b   :  { %949 = vmatpush.msrb.mxu1 %v1613_v55  ;;  %927 = vmatpush.msrb.mxu0 %v1608_v57 }
 0x4c5   :  { %v679_v4 = vpop.f32.mrf.mxu2 }
 0x4c6   :  { %v680_v5 = vadd.f32 %v1673_v3, %v679_v4  ;;  %v1675_v4 = vld [vmem:[%s2311_s11] ss:$0 sm:$0xff] }
 0x4c8   :  { %v685_v6 = vmax.f32 %v680_v5, 0.0 }
 0x4ca   :  { %1582 = vmatmul.msk.f32.vlgmr.msrb.gmra.mxu3 %vm699_vm13, %v685_v6 }
 0x4cd   :  { %v682_v8 = vpop.f32.mrf.mxu2 }
 0x4ce   :  { %v683_v9 = vadd.f32 %v1673_v3, %v682_v8  ;;  %v1676_v8 = vld [vmem:[%s2312_s12] ss:$0 sm:$0xff] }
 0x4d0   :  { %v686_v10 = vmax.f32 %v683_v9, 0.0 }
 0x4d2   :  { %1583 = vmatmul.msk.f32.gmra.mxu3 %vm699_vm13, %v686_v10 }
 0x54d   :  { %v723_v13 = vpop.f32.mrf.mxu3 }
 0x54e   :  { %v724_v14 = vadd.f32 %v1674_v11, %v723_v13 }
 0x550   :  { %v729_v12 = vadd.f32 %v724_v14, %v646_v58  ;;  %v1612_v58 = vld [vmem:[%s2303_s3 + $0x60] sm:$0xff] }
 0x551   :  { %950 = vmatpush.msrb.mxu1 %v1612_v58 }
 0x552   :  { %v733_v15 = vsel %vm60_vm0, %v729_v12, 0.0 }
 0x553   :  { %734 = vadd.xlane.f32.xlu0 %v733_v15 }
 0x555   :  { %v726_v16 = vpop.f32.mrf.mxu3 }
 0x556   :  { %v727_v18 = vadd.f32 %v1674_v11, %v726_v16 }
 0x558   :  { %v730_v19 = vadd.f32 %v727_v18, %v647_v63 }
 0x55a   :  { %v736_v20 = vsel %vm60_vm0, %v730_v19, 0.0 }
 0x55b   :  { %737 = vadd.xlane.f32.xlu1 %v736_v20 }
 0x5c6   :  { %v735_v21 = vpop.xlane.xlu0 %734 }
 0x5c7   :  { %v739_v7 = vmul.f32 %v735_v21, %v1975_v17 }
 0x5c9   :  { %v2038_v22 = vsub.f32 %v729_v12, %v739_v7 }
 0x5cb   :  { %v743_v23 = vmul.f32 %v2038_v22, %v2038_v22 }
 0x5cd   :  { %v745_v24 = vsel %vm60_vm0, %v743_v23, 0.0 }
 0x5ce   :  { %v738_v25 = vpop.xlane.xlu1 %737  ;;  %746 = vadd.xlane.f32.xlu2 %v745_v24 }
 0x5cf   :  { %v740_v26 = vmul.f32 %v738_v25, %v1975_v17 }
 0x5d1   :  { %v2044_v27 = vsub.f32 %v730_v19, %v740_v26 }
 0x5d3   :  { %v744_v28 = vmul.f32 %v2044_v27, %v2044_v27 }
 0x5d5   :  { %v748_v29 = vsel %vm60_vm0, %v744_v28, 0.0 }
 0x5d6   :  { %749 = vadd.xlane.f32.xlu0 %v748_v29 }
 0x641   :  { %v747_v46 = vpop.xlane.xlu2 %746 }
 0x642   :  { %v751_v47 = vmul.f32 %v747_v46, %v1975_v17 }
 0x644   :  { %v753_v48 = vadd.f32 1e-06, %v751_v47 }
 0x646   :  { %1704 = vrsqrt.f32 %v753_v48  ;;  %vm761_vm15 = vweird.f32 %v753_v48 }
 0x649   :  { %v750_v53 = vpop.xlane.xlu0 %749 }
 0x64a   :  { %v752_v56 = vmul.f32 %v750_v53, %v1975_v17 }
 0x64c   :  { %v1705_v59 = vpop.eup %1704  ;;  %v754_v60 = vadd.f32 1e-06, %v752_v56 }
 0x64d   :  { %v756_v61 = vmul.f32 %v1705_v59, %v753_v48  ;;  %vm762_vm14 = vweird.f32 %v1705_v59 }
 0x64e   :  { %1706 = vrsqrt.f32 %v754_v60  ;;  %vm763_vm3 = vmor %vm761_vm15, %vm762_vm14  ;;  %vm771_vm5 = vweird.f32 %v754_v60 }
 0x64f   :  { %v757_v62 = vmul.f32 %v1705_v59, %v756_v61 }
 0x651   :  { %v758_v63 = vmul.f32 0.5, %v757_v62 }
 0x653   :  { %v759_v0 = vsub.f32 1.5, %v758_v63 }
 0x654   :  { %v1707_v1 = vpop.eup %1706 }
 0x655   :  { %v760_v2 = vmul.f32 %v1705_v59, %v759_v0  ;;  %v766_v3 = vmul.f32 %v1707_v1, %v754_v60  ;;  %vm772_vm4 = vweird.f32 %v1707_v1 }
 0x656   :  { %vm773_vm6 = vmor %vm771_vm5, %vm772_vm4 }
 0x657   :  { %v764_v5 = vsel %vm763_vm3, %v1705_v59, %v760_v2  ;;  %v767_v6 = vmul.f32 %v1707_v1, %v766_v3  ;;  %v1633_v59 = vld [vmem:[%s2304_s4 + $0x28] sm:$0xff] }
 0x658   :  { %v775_v9 = vmul.f32 %v764_v5, %v2038_v22 }
 0x659   :  { %v768_v10 = vmul.f32 0.5, %v767_v6 }
 0x65a   :  { %v780_v11 = vmul.f32 %v1675_v4, %v775_v9 }
 0x65b   :  { %v769_v13 = vsub.f32 1.5, %v768_v10 }
 0x65c   :  { %v2130_v14 = vadd.f32 %v1676_v8, %v780_v11 }
 0x65d   :  { %v770_v12 = vmul.f32 %v1707_v1, %v769_v13 }
 0x65e   :  { %1592 = vmatmul.msk.f32.vlgmr.msra.gmra.mxu0 %vm60_vm0, %v2130_v14  ;;  %1594 = vmatmul.msk.f32.vlgmr.msra.gmra.mxu1 %vm60_vm0, %v2130_v14 }
 0x65f   :  { %v774_v15 = vsel %vm773_vm6, %v1707_v1, %v770_v12  ;;  %1604 = vmatmul.msk.f32.vlgmr.msra.gmra.mxu2 %vm60_vm0, %v2130_v14  ;;  %1606 = vmatmul.msk.f32.vlgmr.msra.gmra.mxu3 %vm60_vm0, %v2130_v14 }
 0x660   :  { %v776_v16 = vmul.f32 %v774_v15, %v2044_v27 }
 0x662   :  { %v781_v18 = vmul.f32 %v1675_v4, %v776_v16 }
 0x664   :  { %v2141_v19 = vadd.f32 %v1676_v8, %v781_v18 }
 0x666   :  { %1593 = vmatmul.msk.f32.gmra.mxu0 %vm60_vm0, %v2141_v19  ;;  %1595 = vmatmul.msk.f32.gmra.mxu1 %vm60_vm0, %v2141_v19 }
 0x667   :  { %1605 = vmatmul.msk.f32.gmra.mxu2 %vm60_vm0, %v2141_v19  ;;  %1607 = vmatmul.msk.f32.gmra.mxu3 %vm60_vm0, %v2141_v19 }
 0x66e   :  { %1616 = vmatmul.msk.f32.vlgmr.msrb.gmra.mxu0 %vm60_vm0, %v2130_v14  ;;  %1618 = vmatmul.msk.f32.vlgmr.msrb.gmra.mxu1 %vm60_vm0, %v2130_v14 }
 0x676   :  { %1617 = vmatmul.msk.f32.gmra.mxu0 %vm60_vm0, %v2141_v19  ;;  %1619 = vmatmul.msk.f32.gmra.mxu1 %vm60_vm0, %v2141_v19 }
 0x6db   :  { %v819_v20 = vpop.f32.mrf.mxu0  ;;  %v842_v21 = vpop.f32.mrf.mxu1 }
 0x6e2   :  { %v874_v7 = vpop.f32.mrf.mxu2  ;;  %v897_v22 = vpop.f32.mrf.mxu3 }
 0x6e3   :  { %1620 = vmatpush.xpose.msk.msrb.mxu2 %vm221_vm1, %v874_v7  ;;  %1624 = vmatpush.xpose.msk.msrb.mxu3 %vm221_vm1, %v897_v22  ;;  %v822_v23 = vpop.f32.mrf.mxu0  ;;  %v845_v24 = vpop.f32.mrf.mxu1 }
 0x6e6   :  { %1621 = vmatmul.msk.f32.vlgmr.msrb.gmra.mxu2 %vm221_vm1, %v819_v20  ;;  %1625 = vmatmul.msk.f32.vlgmr.msrb.gmra.mxu3 %vm221_vm1, %v842_v21 }
 0x6ea   :  { %v877_v25 = vpop.f32.mrf.mxu2  ;;  %v900_v26 = vpop.f32.mrf.mxu3 }
 0x6eb   :  { %1622 = vmatpush.xpose.msk.msra.mxu2 %vm221_vm1, %v877_v25  ;;  %1626 = vmatpush.xpose.msk.msra.mxu0 %vm221_vm1, %v900_v26  ;;  %v929_v27 = vpop.f32.mrf.mxu0  ;;  %v952_v28 = vpop.f32.mrf.mxu1 }
 0x6ec   :  { %1176 = vmatpush.msra.mxu1 %v929_v27  ;;  %1222 = vmatpush.msra.mxu3 %v952_v28 }
 0x6ee   :  { %1623 = vmatmul.msk.f32.vlgmr.msra.gmra.mxu2 %vm221_vm1, %v822_v23  ;;  %1627 = vmatmul.msk.f32.vlgmr.msra.gmra.mxu0 %vm221_vm1, %v845_v24 }
 0x6ef   :  { %1275 = vmatpush.msrb.mxu1 %v1633_v59 }
 0x6f3   :  { %v932_v29 = vpop.f32.mrf.mxu0  ;;  %v955_v30 = vpop.f32.mrf.mxu1 }
 0x6f4   :  { %1199 = vmatpush.msrb.mxu2 %v932_v29  ;;  %1245 = vmatpush.msrb.mxu0 %v955_v30 }
 0x769   :  { %v981_v31 = vpop.f32.mrf.mxu2  ;;  %v1033_v32 = vpop.f32.mrf.mxu3 }
 0x76a   :  { %v1068_v33 = vsel %vm326_vm2, %v1033_v32, -inf  ;;  %v1062_v34 = vsel %vm326_vm2, %v981_v31, -inf }
 0x76b   :  { %1069 = vmax.xlane.f32.xlu1 %v1068_v33  ;;  %1063 = vmax.xlane.f32.xlu2 %v1062_v34  ;;  %v1059_v35 = vpop.f32.mrf.mxu0 }
 0x76c   :  { %v1071_v38 = vsel %vm326_vm2, %v1059_v35, -inf }
 0x771   :  { %v1007_v36 = vpop.f32.mrf.mxu2 }
 0x772   :  { %v1065_v37 = vsel %vm326_vm2, %v1007_v36, -inf }
 0x773   :  { %1066 = vmax.xlane.f32.xlu0 %v1065_v37  ;;  %1072 = vmax.xlane.f32.xlu1 %v1071_v38 }
 0x7de   :  { %v1070_v39 = vpop.xlane.xlu1 %1069  ;;  %v1064_v40 = vpop.xlane.xlu2 %1063 }
 0x7df   :  { %v1076_v41 = vsub.f32 %v1033_v32, %v1070_v39  ;;  %v1074_v42 = vsub.f32 %v981_v31, %v1064_v40 }
 0x7e1   :  { %v1082_v43 = vmul.f32 1.442695, %v1076_v41  ;;  %v1078_v44 = vmul.f32 1.442695, %v1074_v42 }
 0x7e3   :  { %1708 = vpow2.f32 %v1082_v43 }
 0x7e4   :  { %1710 = vpow2.f32 %v1078_v44 }
 0x7e6   :  { %v1067_v45 = vpop.xlane.xlu0 %1066  ;;  %v1073_v46 = vpop.xlane.xlu1 %1072 }
 0x7e7   :  { %v1075_v47 = vsub.f32 %v1007_v36, %v1067_v45  ;;  %v1077_v48 = vsub.f32 %v1059_v35, %v1073_v46 }
 0x7e9   :  { %v1709_v49 = vpop.eup %1708  ;;  %v1080_v50 = vmul.f32 1.442695, %v1075_v47  ;;  %v1084_v51 = vmul.f32 1.442695, %v1077_v48  ;;  %v1632_v47 = vld [vmem:[%s2304_s4 + $0x20] sm:$0xff]  ;;  %v1635_v48 = vld [vmem:[%s2304_s4 + $0x38] sm:$0xff] }
 0x7ea   :  { %v1711_v52 = vpop.eup %1710  ;;  %v1092_v53 = vsel %vm326_vm2, %v1709_v49, 0.0  ;;  %1276 = vmatpush.msrb.mxu1 %v1632_v47  ;;  %1304 = vmatpush.msra.mxu2 %v1635_v48 }
 0x7eb   :  { %1712 = vpow2.f32 %v1080_v50  ;;  %1093 = vadd.xlane.f32.xlu2 %v1092_v53  ;;  %v1086_v54 = vsel %vm326_vm2, %v1711_v52, 0.0 }
 0x7ec   :  { %1714 = vpow2.f32 %v1084_v51  ;;  %1087 = vadd.xlane.f32.xlu0 %v1086_v54 }
 0x7f1   :  { %v2173_v55 = vpop.eup %1712 }
 0x7f2   :  { %v2175_v56 = vpop.eup %1714  ;;  %v1089_v57 = vsel %vm326_vm2, %v2173_v55, 0.0 }
 0x7f3   :  { %1090 = vadd.xlane.f32.xlu1 %v1089_v57  ;;  %v1095_v58 = vsel %vm326_vm2, %v2175_v56, 0.0 }
 0x7f4   :  { %1096 = vadd.xlane.f32.xlu2 %v1095_v58 }
 0x85e   :  { %v1094_v60 = vpop.xlane.xlu2 %1093 }
 0x85f   :  { %1716 = vrcp.f32 %v1094_v60  ;;  %v1088_v61 = vpop.xlane.xlu0 %1087  ;;  %v1139_v5 = vand.u32 2147483648, %v1094_v60  ;;  %v1137_v9 = vand.u32 2147483647, %v1094_v60  ;;  %vm1133_vm9 = vweird.f32 %v1094_v60 }
 0x860   :  { %1718 = vrcp.f32 %v1088_v61  ;;  %v1109_v10 = vand.u32 2147483648, %v1088_v61  ;;  %v1107_v13 = vand.u32 2147483647, %v1088_v61  ;;  %vm1103_vm11 = vweird.f32 %v1088_v61 }
 0x861   :  { %v1140_v16 = vor.u32 1.1754944e-38, %v1139_v5  ;;  %vm1138_vm12 = vcmp.eq.f32.partialorder %v1137_v9, 8.507059e+37 }
 0x862   :  { %v1110_v7 = vor.u32 1.1754944e-38, %v1109_v10  ;;  %vm1108_vm15 = vcmp.eq.f32.partialorder %v1107_v13, 8.507059e+37 }
 0x865   :  { %v1717_v62 = vpop.eup %1716 }
 0x866   :  { %v1719_v63 = vpop.eup %1718  ;;  %v1129_v0 = vmul.f32 %v1717_v62, %v1094_v60  ;;  %v1091_v1 = vpop.xlane.xlu1 %1090  ;;  %vm1134_vm7 = vweird.f32 %v1717_v62 }
 0x867   :  { %v1099_v2 = vmul.f32 %v1719_v63, %v1088_v61  ;;  %v1097_v3 = vpop.xlane.xlu2 %1096  ;;  %1720 = vrcp.f32 %v1091_v1  ;;  %vm1104_vm8 = vweird.f32 %v1719_v63  ;;  %vm1135_vm10 = vmor %vm1133_vm9, %vm1134_vm7  ;;  %v1124_v30 = vand.u32 2147483648, %v1091_v1 }
 0x868   :  { %v1130_v4 = vsub.f32 1.0, %v1129_v0  ;;  %1722 = vrcp.f32 %v1097_v3  ;;  %vm1105_vm14 = vmor %vm1103_vm11, %vm1104_vm8  ;;  %v1154_v32 = vand.u32 2147483648, %v1097_v3  ;;  %v1122_v34 = vand.u32 2147483647, %v1091_v1 }
 0x869   :  { %v1100_v6 = vsub.f32 1.0, %v1099_v2  ;;  %v1152_v36 = vand.u32 2147483647, %v1097_v3  ;;  %vm1118_vm5 = vweird.f32 %v1091_v1  ;;  %vm1148_vm6 = vweird.f32 %v1097_v3 }
 0x86a   :  { %v1131_v8 = vmul.f32 %v1717_v62, %v1130_v4  ;;  %v1125_v39 = vor.u32 1.1754944e-38, %v1124_v30  ;;  %v1155_v40 = vor.u32 1.1754944e-38, %v1154_v32  ;;  %vm1123_vm9 = vcmp.eq.f32.partialorder %v1122_v34, 8.507059e+37  ;;  %v1652_v30 = vld [vmem:[%s2309_s9 + $0x58] sm:$0xff] }
 0x86b   :  { %v1101_v11 = vmul.f32 %v1719_v63, %v1100_v6 }
 0x86c   :  { %v1132_v12 = vadd.f32 %v1717_v62, %v1131_v8 }
 0x86d   :  { %v1721_v15 = vpop.eup %1720  ;;  %v1102_v18 = vadd.f32 %v1719_v63, %v1101_v11 }
 0x86e   :  { %v1723_v20 = vpop.eup %1722  ;;  %v1136_v21 = vsel %vm1135_vm10, %v1717_v62, %v1132_v12  ;;  %v1114_v22 = vmul.f32 %v1721_v15, %v1091_v1  ;;  %vm1119_vm3 = vweird.f32 %v1721_v15  ;;  %vm1153_vm10 = vcmp.eq.f32.partialorder %v1152_v36, 8.507059e+37 }
 0x86f   :  { %v1141_v23 = vsel %vm1138_vm12, %v1140_v16, %v1136_v21  ;;  %v1106_v24 = vsel %vm1105_vm14, %v1719_v63, %v1102_v18  ;;  %v1144_v25 = vmul.f32 %v1723_v20, %v1097_v3  ;;  %vm1149_vm4 = vweird.f32 %v1723_v20  ;;  %vm1120_vm7 = vmor %vm1118_vm5, %vm1119_vm3  ;;  %v1643_v16 = vld [vmem:[%s2308_s7 + $0x28] sm:$0xff]  ;;  %v1642_v18 = vld [vmem:[%s2308_s7 + $0x20] sm:$0xff] }
 0x870   :  { %v1111_v26 = vsel %vm1108_vm15, %v1110_v7, %v1106_v24  ;;  %v1115_v27 = vsub.f32 1.0, %v1114_v22  ;;  %v1142_v28 = vmul.f32 %v1709_v49, %v1141_v23  ;;  %vm1150_vm8 = vmor %vm1148_vm6, %vm1149_vm4  ;;  %v1634_v49 = vld [vmem:[%s2304_s4 + $0x30] sm:$0xff]  ;;  %v1656_v22 = vld [vmem:[%s2309_s9 + $0x78] sm:$0xff] }
 0x871   :  { %v1145_v29 = vsub.f32 1.0, %v1144_v25  ;;  %v1112_v31 = vmul.f32 %v1711_v52, %v1111_v26  ;;  %1305 = vmatpush.msra.mxu2 %v1634_v49  ;;  %v1655_v23 = vld [vmem:[%s2309_s9 + $0x70] sm:$0xff]  ;;  %1448 = vmatpush.msra.mxu0 %v1656_v22  ;;  %v1654_v24 = vld [vmem:[%s2309_s9 + $0x68] sm:$0xff] }
 0x872   :  { %v1116_v33 = vmul.f32 %v1721_v15, %v1115_v27  ;;  %1630 = vmatmul.msk.f32.vlgmr.msra.gmra.mxu3 %vm326_vm2, %v1142_v28  ;;  %v1653_v27 = vld [vmem:[%s2309_s9 + $0x60] sm:$0xff] }
 0x873   :  { %v1146_v35 = vmul.f32 %v1723_v20, %v1145_v29  ;;  %1628 = vmatmul.msk.f32.vlgmr.msra.gmra.mxu1 %vm326_vm2, %v1112_v31  ;;  %1449 = vmatpush.msra.mxu0 %v1655_v23 }
 0x874   :  { %v1117_v37 = vadd.f32 %v1721_v15, %v1116_v33 }
 0x875   :  { %v1147_v38 = vadd.f32 %v1723_v20, %v1146_v35  ;;  %1450 = vmatpush.msra.mxu0 %v1654_v24 }
 0x876   :  { %v1121_v41 = vsel %vm1120_vm7, %v1721_v15, %v1117_v37  ;;  %v1644_v15 = vld [vmem:[%s2308_s7 + $0x30] sm:$0xff] }
 0x877   :  { %v1151_v42 = vsel %vm1150_vm8, %v1723_v20, %v1147_v38  ;;  %v1126_v43 = vsel %vm1123_vm9, %v1125_v39, %v1121_v41  ;;  %1451 = vmatpush.msra.mxu0 %v1653_v27  ;;  %v1677_v38 = vld [vmem:[%s2305_s5 + $0x1] ss:$0 sm:$0xff] }
 0x878   :  { %v1156_v44 = vsel %vm1153_vm10, %v1155_v40, %v1151_v42  ;;  %v1127_v45 = vmul.f32 %v2173_v55, %v1126_v43  ;;  %v1678_v42 = vld [vmem:[%s2306_s6 + $0x1] ss:$0 sm:$0xff] }
 0x879   :  { %v1157_v46 = vmul.f32 %v2175_v56, %v1156_v44  ;;  %1452 = vmatpush.msra.mxu0 %v1652_v30 }
 0x87a   :  { %1629 = vmatmul.msk.f32.vlgmr.msrb.gmra.mxu2 %vm326_vm2, %v1127_v45 }
 0x87b   :  { %1631 = vmatmul.msk.f32.vlgmr.msrb.gmra.mxu0 %vm326_vm2, %v1157_v46 }
 0x8f0   :  { %v1178_v50 = vpop.f32.mrf.mxu1 }
 0x8f1   :  { %1636 = vmatmul.msk.f32.vlgmr.msrb.gmra.mxu1 %vm221_vm1, %v1178_v50 }
 0x8f5   :  { %v1224_v51 = vpop.f32.mrf.mxu3 }
 0x8f6   :  { %1638 = vmatmul.msk.f32.vlgmr.msra.gmra.mxu2 %vm221_vm1, %v1224_v51 }
 0x8f8   :  { %v1247_v52 = vpop.f32.mrf.mxu0 }
 0x8fd   :  { %v1201_v53 = vpop.f32.mrf.mxu2 }
 0x8fe   :  { %1637 = vmatmul.msk.f32.gmra.mxu1 %vm221_vm1, %v1201_v53  ;;  %1639 = vmatmul.msk.f32.gmra.mxu2 %vm221_vm1, %v1247_v52  ;;  %v1651_v52 = vld [vmem:[%s2309_s9 + $0x50] sm:$0xff]  ;;  %v1650_v53 = vld [vmem:[%s2309_s9 + $0x48] sm:$0xff] }
 0x8ff   :  { %1453 = vmatpush.msra.mxu0 %v1651_v52 }
 0x901   :  { %1454 = vmatpush.msra.mxu0 %v1650_v53 }
 0x96e   :  { %v1278_v54 = vpop.f32.mrf.mxu1 }
 0x96f   :  { %v1313_v56 = vsel %vm60_vm0, %v1278_v54, 0.0  ;;  %v1649_v54 = vld [vmem:[%s2309_s9 + $0x40] sm:$0xff] }
 0x970   :  { %1455 = vmatpush.msra.mxu0 %v1649_v54 }
 0x979   :  { %v1307_v55 = vpop.f32.mrf.mxu2 }
 0x97a   :  { %v1314_v57 = vsel %vm60_vm0, %v1307_v55, 0.0  ;;  %v1679_v55 = vld [vmem:[%s2307_s8 + $0x1] ss:$0 sm:$0xff] }
 0x97b   :  { %v1315_v58 = vadd.f32 %v1314_v57, %v1313_v56  ;;  %v1281_v60 = vpop.f32.mrf.mxu1 }
 0x97c   :  { %v1316_v63 = vsel %vm60_vm0, %v1281_v60, 0.0 }
 0x97d   :  { %v1319_v59 = vadd.f32 %v1315_v58, %v2130_v14 }
 0x97f   :  { %v1325_v61 = vsel %vm60_vm0, %v1319_v59, 0.0 }
 0x980   :  { %1326 = vadd.xlane.f32.xlu0 %v1325_v61 }
 0x981   :  { %v1310_v62 = vpop.f32.mrf.mxu2 }
 0x982   :  { %v1317_v0 = vsel %vm60_vm0, %v1310_v62, 0.0  ;;  %v1680_v62 = vld [vmem:[%s2310_s10 + $0x1] ss:$0 sm:$0xff] }
 0x983   :  { %v1318_v1 = vadd.f32 %v1317_v0, %v1316_v63 }
 0x985   :  { %v1320_v2 = vadd.f32 %v1318_v1, %v2141_v19  ;;  %v1645_v19 = vld [vmem:[%s2308_s7 + $0x38] sm:$0xff] }
 0x986   :  { %1407 = vmatpush.msrb.mxu3 %v1645_v19 }
 0x987   :  { %v1328_v3 = vsel %vm60_vm0, %v1320_v2, 0.0 }
 0x988   :  { %1329 = vadd.xlane.f32.xlu1 %v1328_v3  ;;  %1408 = vmatpush.msrb.mxu3 %v1644_v15 }
 0x98a   :  { %1409 = vmatpush.msrb.mxu3 %v1643_v16 }
 0x98c   :  { %1410 = vmatpush.msrb.mxu3 %v1642_v18  ;;  %v1512_v18 = vld [vmem:[%s2314_s13 + $0x18] sm:$0xff] }
 0x98d   :  { %1535 = vmatpush.msra.mxu1 %v1512_v18 }
 0x9f3   :  { %v1327_v4 = vpop.xlane.xlu0 %1326 }
 0x9f4   :  { %v1331_v5 = vmul.f32 %v1327_v4, %v1975_v17 }
 0x9f6   :  { %v1333_v6 = vsub.f32 %v1319_v59, %v1331_v5 }
 0x9f8   :  { %v1335_v14 = vmul.f32 %v1333_v6, %v1333_v6 }
 0x9fa   :  { %v1337_v8 = vsel %vm60_vm0, %v1335_v14, 0.0 }
 0x9fb   :  { %1338 = vadd.xlane.f32.xlu2 %v1337_v8  ;;  %v1330_v9 = vpop.xlane.xlu1 %1329 }
 0x9fc   :  { %v1332_v10 = vmul.f32 %v1330_v9, %v1975_v17 }
 0x9fe   :  { %v1334_v11 = vsub.f32 %v1320_v2, %v1332_v10 }
 0xa00   :  { %v1336_v13 = vmul.f32 %v1334_v11, %v1334_v11 }
 0xa02   :  { %v1340_v12 = vsel %vm60_vm0, %v1336_v13, 0.0 }
 0xa03   :  { %1341 = vadd.xlane.f32.xlu0 %v1340_v12 }
 0xa6e   :  { %v1339_v20 = vpop.xlane.xlu2 %1338 }
 0xa6f   :  { %v1343_v21 = vmul.f32 %v1339_v20, %v1975_v17  ;;  %v1511_v20 = vld [vmem:[%s2314_s13 + $0x10] sm:$0xff] }
 0xa70   :  { %1536 = vmatpush.msra.mxu1 %v1511_v20 }
 0xa71   :  { %v1345_v7 = vadd.f32 1e-06, %v1343_v21  ;;  %v1510_v21 = vld [vmem:[%s2314_s13 + $0x8] sm:$0xff] }
 0xa72   :  { %1537 = vmatpush.msra.mxu1 %v1510_v21 }
 0xa73   :  { %1724 = vrsqrt.f32 %v1345_v7  ;;  %vm1353_vm2 = vweird.f32 %v1345_v7 }
 0xa76   :  { %v1342_v25 = vpop.xlane.xlu0 %1341 }
 0xa77   :  { %v1344_v26 = vmul.f32 %v1342_v25, %v1975_v17 }
 0xa79   :  { %v1725_v28 = vpop.eup %1724  ;;  %v1346_v29 = vadd.f32 1e-06, %v1344_v26 }
 0xa7a   :  { %v1348_v31 = vmul.f32 %v1725_v28, %v1345_v7  ;;  %vm1354_vm1 = vweird.f32 %v1725_v28  ;;  %v1509_v7 = vld [vmem:[%s2314_s13] sm:$0xff] }
 0xa7b   :  { %1726 = vrsqrt.f32 %v1346_v29  ;;  %vm1355_vm11 = vmor %vm1353_vm2, %vm1354_vm1  ;;  %vm1363_vm14 = vweird.f32 %v1346_v29  ;;  %1538 = vmatpush.msra.mxu1 %v1509_v7 }
 0xa7c   :  { %v1349_v32 = vmul.f32 %v1725_v28, %v1348_v31 }
 0xa7e   :  { %v1350_v33 = vmul.f32 0.5, %v1349_v32 }
 0xa80   :  { %v1351_v34 = vsub.f32 1.5, %v1350_v33 }
 0xa81   :  { %v1727_v35 = vpop.eup %1726 }
 0xa82   :  { %v1352_v36 = vmul.f32 %v1725_v28, %v1351_v34  ;;  %v1358_v37 = vmul.f32 %v1727_v35, %v1346_v29  ;;  %vm1364_vm12 = vweird.f32 %v1727_v35 }
 0xa83   :  { %vm1365_vm15 = vmor %vm1363_vm14, %vm1364_vm12 }
 0xa84   :  { %v1356_v39 = vsel %vm1355_vm11, %v1725_v28, %v1352_v36  ;;  %v1359_v40 = vmul.f32 %v1727_v35, %v1358_v37 }
 0xa85   :  { %v1367_v41 = vmul.f32 %v1356_v39, %v1333_v6 }
 0xa86   :  { %v1360_v43 = vmul.f32 0.5, %v1359_v40 }
 0xa87   :  { %v1372_v44 = vmul.f32 %v1677_v38, %v1367_v41 }
 0xa88   :  { %v1361_v45 = vsub.f32 1.5, %v1360_v43  ;;  %v1681_v43 = vld [vmem:[%s2313_s14] ss:$0 sm:$0xff] }
 0xa89   :  { %v1377_v46 = vadd.f32 %v1678_v42, %v1372_v44 }
 0xa8a   :  { %v1362_v47 = vmul.f32 %v1727_v35, %v1361_v45 }
 0xa8b   :  { %1647 = vmatmul.msk.f32.vlgmr.msrb.gmra.mxu3 %vm60_vm0, %v1377_v46 }
 0xa8c   :  { %v1366_v48 = vsel %vm1365_vm15, %v1727_v35, %v1362_v47 }
 0xa8d   :  { %v1368_v49 = vmul.f32 %v1366_v48, %v1334_v11 }
 0xa8f   :  { %v1373_v50 = vmul.f32 %v1677_v38, %v1368_v49 }
 0xa91   :  { %v1378_v51 = vadd.f32 %v1678_v42, %v1373_v50 }
 0xa93   :  { %1648 = vmatmul.msk.f32.gmra.mxu3 %vm60_vm0, %v1378_v51 }
 0xb0e   :  { %v1412_v56 = vpop.f32.mrf.mxu3 }
 0xb0f   :  { %v1413_v57 = vadd.f32 %v1679_v55, %v1412_v56 }
 0xb11   :  { %v1418_v58 = vmax.f32 %v1413_v57, 0.0 }
 0xb13   :  { %1658 = vmatmul.msk.f32.vlgmr.msra.gmra.mxu0 %vm699_vm13, %v1418_v58 }
 0xb16   :  { %v1415_v59 = vpop.f32.mrf.mxu3 }
 0xb17   :  { %v1416_v60 = vadd.f32 %v1679_v55, %v1415_v59 }
 0xb19   :  { %v1419_v61 = vmax.f32 %v1416_v60, 0.0 }
 0xb1b   :  { %1659 = vmatmul.msk.f32.gmra.mxu0 %vm699_vm13, %v1419_v61 }
 0xb90   :  { %v1457_v63 = vpop.f32.mrf.mxu0 }
 0xb91   :  { %v1458_v0 = vadd.f32 %v1680_v62, %v1457_v63 }
 0xb93   :  { %v1463_v1 = vadd.f32 %v1458_v0, %v1377_v46 }
 0xb95   :  { %v1465_v2 = vsel %vm60_vm0, %v1463_v1, 0.0 }
 0xb96   :  { %1466 = vadd.xlane.f32.xlu1 %v1465_v2 }
 0xb98   :  { %v1460_v3 = vpop.f32.mrf.mxu0 }
 0xb99   :  { %v1461_v4 = vadd.f32 %v1680_v62, %v1460_v3 }
 0xb9b   :  { %v1464_v5 = vadd.f32 %v1461_v4, %v1378_v51 }
 0xb9d   :  { %v1468_v6 = vsel %vm60_vm0, %v1464_v5, 0.0 }
 0xb9e   :  { %1469 = vadd.xlane.f32.xlu2 %v1468_v6 }
 0xc09   :  { %v1467_v14 = vpop.xlane.xlu1 %1466 }
 0xc0a   :  { %v1471_v8 = vmul.f32 %v1467_v14, %v1975_v17 }
 0xc0c   :  { %v1473_v9 = vsub.f32 %v1463_v1, %v1471_v8 }
 0xc0e   :  { %v1475_v10 = vmul.f32 %v1473_v9, %v1473_v9 }
 0xc10   :  { %v1477_v11 = vsel %vm60_vm0, %v1475_v10, 0.0 }
 0xc11   :  { %v1470_v13 = vpop.xlane.xlu2 %1469  ;;  %1478 = vadd.xlane.f32.xlu0 %v1477_v11 }
 0xc12   :  { %v1472_v12 = vmul.f32 %v1470_v13, %v1975_v17 }
 0xc14   :  { %v1474_v19 = vsub.f32 %v1464_v5, %v1472_v12 }
 0xc16   :  { %v1476_v15 = vmul.f32 %v1474_v19, %v1474_v19 }
 0xc18   :  { %v1480_v16 = vsel %vm60_vm0, %v1476_v15, 0.0 }
 0xc19   :  { %1481 = vadd.xlane.f32.xlu1 %v1480_v16 }
 0xc84   :  { %v1479_v22 = vpop.xlane.xlu0 %1478 }
 0xc85   :  { %v1483_v23 = vmul.f32 %v1479_v22, %v1975_v17 }
 0xc87   :  { %v1485_v24 = vadd.f32 1e-06, %v1483_v23 }
 0xc89   :  { %1728 = vrsqrt.f32 %v1485_v24  ;;  %vm1493_vm3 = vweird.f32 %v1485_v24 }
 0xc8c   :  { %v1482_v25 = vpop.xlane.xlu1 %1481 }
 0xc8d   :  { %v1484_v26 = vmul.f32 %v1482_v25, %v1975_v17 }
 0xc8f   :  { %v1729_v27 = vpop.eup %1728  ;;  %v1486_v28 = vadd.f32 1e-06, %v1484_v26 }
 0xc90   :  { %v1488_v29 = vmul.f32 %v1729_v27, %v1485_v24  ;;  %vm1494_vm13 = vweird.f32 %v1729_v27 }
 0xc91   :  { %1730 = vrsqrt.f32 %v1486_v28  ;;  %vm1495_vm4 = vmor %vm1493_vm3, %vm1494_vm13  ;;  %vm1503_vm6 = vweird.f32 %v1486_v28 }
 0xc92   :  { %v1489_v30 = vmul.f32 %v1729_v27, %v1488_v29 }
 0xc94   :  { %v1490_v31 = vmul.f32 0.5, %v1489_v30 }
 0xc96   :  { %v1491_v32 = vsub.f32 1.5, %v1490_v31 }
 0xc97   :  { %v1731_v33 = vpop.eup %1730 }
 0xc98   :  { %v1492_v34 = vmul.f32 %v1729_v27, %v1491_v32  ;;  %v1498_v35 = vmul.f32 %v1731_v33, %v1486_v28  ;;  %vm1504_vm5 = vweird.f32 %v1731_v33 }
 0xc99   :  { %vm1505_vm7 = vmor %vm1503_vm6, %vm1504_vm5 }
 0xc9a   :  { %v1496_v36 = vsel %vm1495_vm4, %v1729_v27, %v1492_v34  ;;  %v1499_v37 = vmul.f32 %v1731_v33, %v1498_v35 }
 0xc9b   :  { %v1507_v38 = vmul.f32 %v1496_v36, %v1473_v9 }
 0xc9c   :  { %v1500_v39 = vmul.f32 0.5, %v1499_v37 }
 0xc9d   :  { %1660 = vmatmul.msk.f32.vlgmr.msra.gmra.mxu1 %vm60_vm0, %v1507_v38 }
 0xc9e   :  { %v1501_v17 = vsub.f32 1.5, %v1500_v39 }
 0xca0   :  { %v1502_v40 = vmul.f32 %v1731_v33, %v1501_v17 }
 0xca2   :  { %v1506_v41 = vsel %vm1505_vm7, %v1731_v33, %v1502_v40 }
 0xca3   :  { %v1508_v42 = vmul.f32 %v1506_v41, %v1474_v19 }
 0xca5   :  { %1661 = vmatmul.msk.f32.gmra.mxu1 %vm60_vm0, %v1508_v42 }
 0xd1a   :  { %v1540_v44 = vpop.f32.mrf.mxu1 }
 0xd1b   :  { %v1541_v45 = vadd.f32 %v1681_v43, %v1540_v44 }
 0xd1d   :  { %1546 = vst [vmem:[%s2315_s15] sm:$0xff] %v1541_v45 }
 0xd22   :  { %v1543_v46 = vpop.f32.mrf.mxu1 }
 0xd23   :  { %v1544_v47 = vadd.f32 %v1681_v43, %v1543_v46 }
 0xd25   :  { %1547 = vst [vmem:[%s2315_s15 + $0x8] sm:$0xff] %v1544_v47 }

</bundles_post_ra>
